<compile_context>
chip_gen: v7x
topology: tpu7x:2x2x1
jax: 0.10.0
libtpu: 0.0.40
codegen_flags: <defaults>
</compile_context>

<pallas_src>
import numpy as np
import jax
import jax.numpy as jnp
from jax.experimental import pallas as pl
from jax.experimental.pallas import tpu as pltpu


# ------------------------- fused LSTM + Linear kernel --------------------------
def _make_fused_lstm_kernel(depth, T, B):
    """Fused kernel: `depth`-layer LSTM over T steps + bias-free output Linear."""

    def kernel(*refs):
        x_ref = refs[0]                                     # (T*B, I), t-outer/b-inner
        layer_refs = [refs[1 + 3 * l: 4 + 3 * l] for l in range(depth)]
        w_out_ref = refs[1 + 3 * depth]                     # (T*H, O)
        o_ref = refs[2 + 3 * depth]                         # (B, O)
        h_seq_ref = refs[3 + 3 * depth]                     # VMEM scratch (T*B, H)

        H = layer_refs[0][1].shape[0]
        O = w_out_ref.shape[1]

        hs = []
        for li, (wih_ref, whh_ref, b_ref) in enumerate(layer_refs):
            wih = wih_ref[...]                              # (K, 4H)
            whh = whh_ref[...]                              # (H, 4H)

            # Batched input projection for ALL timesteps (off the serial chain):
            # one (T*B, K)@(K, 4H) matmul + broadcast bias.
            x_stack = x_ref[...] if li == 0 else h_seq_ref[...]
            g_in = (jnp.dot(x_stack, wih, preferred_element_type=jnp.float32)
                    + jnp.broadcast_to(b_ref[...], (T * B, 4 * H)))

            h = jnp.zeros((B, H), jnp.float32)
            c = jnp.zeros((B, H), jnp.float32)
            hs = []
            for t in range(T):
                # Serial chain per cell: 1 matmul + 1 add.
                gates = g_in[t * B:(t + 1) * B, :] + jnp.dot(
                    h, whh, preferred_element_type=jnp.float32)
                sg = jax.nn.sigmoid(gates)                  # full 4H = one vreg wide
                i_g = sg[:, 0 * H:1 * H]
                f_g = sg[:, 1 * H:2 * H]
                o_g = sg[:, 3 * H:4 * H]
                g_g = jnp.tanh(gates[:, 2 * H:3 * H])       # tanh on H lanes only
                c = f_g * c + i_g * g_g
                h = o_g * jnp.tanh(c)
                hs.append(h)
                if li + 1 < depth:
                    # Stash h_t for the next layer's batched input projection.
                    h_seq_ref[t * B:(t + 1) * B, :] = h
                # TODO(synk): nn.LSTM inter-layer dropout (p=0.5) is train-mode
                # only; eval-mode semantics (no dropout) are implemented here.

        # Bias-free output Linear, fully after the recurrence.  Flatten order is
        # (T outer, H inner), so weight rows t*H:(t+1)*H match h_t.
        acc = jnp.zeros((B, O), jnp.float32)
        for t in range(T):
            acc = acc + jnp.dot(hs[t], w_out_ref[t * H:(t + 1) * H, :],
                                preferred_element_type=jnp.float32)
        o_ref[...] = acc

    return kernel


# --------------------------------- forward ------------------------------------
def model_forward(x, params, final_out_shape):
    """x: (B, in_chunk, in_components) batch-first, as in Model._regression."""
    B, T, I = x.shape
    depth = len(params["lstm"])
    H = params["lstm"][0][1].shape[0]
    O = params["w_out_t"].shape[1]

    # Stack timesteps for the batched layer-0 input projection: (T*B, I),
    # row order (t outer, b inner).  Free XLA reshape outside the kernel.
    x2d = jnp.transpose(x, (1, 0, 2)).reshape(T * B, I).astype(jnp.float32)

    flat_lstm = [w for layer in params["lstm"] for w in layer]
    vmem_spec = pl.BlockSpec(memory_space=pltpu.MemorySpace.VMEM)

    out = pl.pallas_call(
        _make_fused_lstm_kernel(depth, T, B),
        out_shape=jax.ShapeDtypeStruct((B, O), jnp.float32),
        in_specs=[vmem_spec] * (2 + len(flat_lstm)),
        out_specs=pl.BlockSpec(memory_space=pltpu.MemorySpace.VMEM),
        scratch_shapes=[pltpu.VMEM((T * B, H), jnp.float32)],
    )(x2d, *flat_lstm, params["w_out_t"])
    return out.reshape(B, final_out_shape[0], final_out_shape[1])


# ------------------------------ parameter init --------------------------------
def init_params(key, input_size, hidden, depth, in_chunk, out_features):
    params = {"lstm": []}
    bound = 1.0 / np.sqrt(hidden)
    for layer in range(depth):
        in_dim = input_size if layer == 0 else hidden
        key, k1, k2, k3, k4 = jax.random.split(key, 5)
        w_ih = jax.random.uniform(k1, (4 * hidden, in_dim), jnp.float32, -bound, bound)
        w_hh = jax.random.uniform(k2, (4 * hidden, hidden), jnp.float32, -bound, bound)
        b_ih = jax.random.uniform(k3, (4 * hidden,), jnp.float32, -bound, bound)
        b_hh = jax.random.uniform(k4, (4 * hidden,), jnp.float32, -bound, bound)
        params["lstm"].append(
            (w_ih.T, w_hh.T, (b_ih + b_hh).reshape(1, 4 * hidden)))
    feat = hidden * in_chunk
    key, k5 = jax.random.split(key)
    w_out = jax.random.uniform(k5, (out_features, feat), jnp.float32,
                               -1.0 / np.sqrt(feat), 1.0 / np.sqrt(feat))
    params["w_out_t"] = w_out.T
    return params


# ------------------------------ pure-JAX reference ----------------------------
def reference_forward(x, params, final_out_shape):
    B, T, _ = x.shape
    seq = jnp.transpose(x, (1, 0, 2)).astype(jnp.float32)
    for (wih_t, whh_t, bias) in params["lstm"]:
        H = whh_t.shape[0]

        def step(carry, x_t):
            h, c = carry
            g = x_t @ wih_t + h @ whh_t + bias
            i = jax.nn.sigmoid(g[:, :H])
            f = jax.nn.sigmoid(g[:, H:2 * H])
            gg = jnp.tanh(g[:, 2 * H:3 * H])
            o = jax.nn.sigmoid(g[:, 3 * H:])
            c = f * c + i * gg
            h = o * jnp.tanh(c)
            return (h, c), h

        init = (jnp.zeros((B, H), jnp.float32), jnp.zeros((B, H), jnp.float32))
        _, seq = jax.lax.scan(step, init, seq)
    hidden = jnp.transpose(seq, (1, 0, 2)).reshape(B, -1)
    out = hidden @ params["w_out_t"]
    return out.reshape(B, final_out_shape[0], final_out_shape[1])


if __name__ == "__main__":
    # Model(input_dim=[8, 4], output_dim=[4, 3], task_name='regression',
    #       arch_args={'width': 32, 'depth': 2})
    B, in_chunk, in_components = 2, 8, 4
    hidden, depth = 32, 2
    output_dim = [4, 3]

    key = jax.random.PRNGKey(0)
    key, kx = jax.random.split(key)
    x = jax.random.normal(kx, (B, in_chunk, in_components), jnp.float32)
    params = init_params(key, in_components, hidden, depth,
                         in_chunk, int(np.prod(output_dim)))

    out = jax.jit(lambda xx: model_forward(xx, params, output_dim))(x)
    jax.block_until_ready(out)

    ref = reference_forward(x, params, output_dim)
    np.testing.assert_allclose(np.asarray(out), np.asarray(ref),
                               rtol=1e-5, atol=1e-5)
    assert out.shape == (B, output_dim[0], output_dim[1])
    print("KERNEL_OK")
</pallas_src>

<mosaic_0001>
module attributes {stable_mosaic.version = 11 : i64} {
  func.func @kernel(%arg0: memref<16x4xf32, #tpu.memory_space<vmem>>, %arg1: memref<4x128xf32, #tpu.memory_space<vmem>>, %arg2: memref<32x128xf32, #tpu.memory_space<vmem>>, %arg3: memref<1x128xf32, #tpu.memory_space<vmem>>, %arg4: memref<32x128xf32, #tpu.memory_space<vmem>>, %arg5: memref<32x128xf32, #tpu.memory_space<vmem>>, %arg6: memref<1x128xf32, #tpu.memory_space<vmem>>, %arg7: memref<256x12xf32, #tpu.memory_space<vmem>>, %arg8: memref<2x12xf32, #tpu.memory_space<vmem>>, %arg9: memref<16x32xf32, #tpu.memory_space<vmem>>) attributes {dimension_semantics = [], scalar_prefetch = 0 : i64, scratch_operands = 1 : i64, tpu.core_type = #tpu.core_type<tc>} {
    %c0 = arith.constant 0 : index
    %c0_0 = arith.constant 0 : index
    %0 = vector.load %arg1[%c0, %c0_0] : memref<4x128xf32, #tpu.memory_space<vmem>>, vector<4x128xf32>
    %c0_1 = arith.constant 0 : index
    %c0_2 = arith.constant 0 : index
    %1 = vector.load %arg2[%c0_1, %c0_2] : memref<32x128xf32, #tpu.memory_space<vmem>>, vector<32x128xf32>
    %c0_3 = arith.constant 0 : index
    %c0_4 = arith.constant 0 : index
    %2 = vector.load %arg0[%c0_3, %c0_4] : memref<16x4xf32, #tpu.memory_space<vmem>>, vector<16x4xf32>
    %cst = arith.constant dense<0.000000e+00> : vector<16x128xf32>
    %3 = tpu.matmul %2, %0, %cst {dimension_numbers = #tpu.dot_dimension_numbers<[1], [0], [0], [1], [0, 0, 1, 1], [], []>} : vector<16x4xf32>, vector<4x128xf32>, vector<16x128xf32> -> vector<16x128xf32>
    %c0_5 = arith.constant 0 : index
    %c0_6 = arith.constant 0 : index
    %4 = vector.load %arg3[%c0_5, %c0_6] : memref<1x128xf32, #tpu.memory_space<vmem>>, vector<1x128xf32>
    %5 = vector.shape_cast %4 : vector<1x128xf32> to vector<1x128xf32>
    %6 = vector.broadcast %5 : vector<1x128xf32> to vector<16x128xf32>
    %7 = arith.addf %3, %6 : vector<16x128xf32>
    %cst_7 = arith.constant 0.000000e+00 : f32
    %8 = vector.broadcast %cst_7 : f32 to vector<2x32xf32>
    %cst_8 = arith.constant 0.000000e+00 : f32
    %9 = vector.broadcast %cst_8 : f32 to vector<2x32xf32>
    %10 = vector.extract_strided_slice %7 {offsets = [0, 0], sizes = [2, 128], strides = [1, 1]} : vector<16x128xf32> to vector<2x128xf32>
    %cst_9 = arith.constant dense<0.000000e+00> : vector<2x128xf32>
    %11 = tpu.matmul %8, %1, %cst_9 {dimension_numbers = #tpu.dot_dimension_numbers<[1], [0], [0], [1], [0, 0, 1, 1], [], []>} : vector<2x32xf32>, vector<32x128xf32>, vector<2x128xf32> -> vector<2x128xf32>
    %12 = arith.addf %10, %11 : vector<2x128xf32>
    %13 = arith.negf %12 : vector<2x128xf32>
    %14 = math.exp %13 : vector<2x128xf32>
    %cst_10 = arith.constant 1.000000e+00 : f32
    %15 = vector.broadcast %cst_10 : f32 to vector<2x128xf32>
    %16 = arith.addf %15, %14 : vector<2x128xf32>
    %17 = arith.divf %15, %16 : vector<2x128xf32>
    %18 = vector.extract_strided_slice %17 {offsets = [0, 0], sizes = [2, 32], strides = [1, 1]} : vector<2x128xf32> to vector<2x32xf32>
    %19 = vector.extract_strided_slice %17 {offsets = [0, 32], sizes = [2, 32], strides = [1, 1]} : vector<2x128xf32> to vector<2x32xf32>
    %20 = vector.extract_strided_slice %17 {offsets = [0, 96], sizes = [2, 32], strides = [1, 1]} : vector<2x128xf32> to vector<2x32xf32>
    %21 = vector.extract_strided_slice %12 {offsets = [0, 64], sizes = [2, 32], strides = [1, 1]} : vector<2x128xf32> to vector<2x32xf32>
    %22 = math.tanh %21 : vector<2x32xf32>
    %23 = arith.mulf %19, %9 : vector<2x32xf32>
    %24 = arith.mulf %18, %22 : vector<2x32xf32>
    %25 = arith.addf %23, %24 : vector<2x32xf32>
    %26 = math.tanh %25 : vector<2x32xf32>
    %27 = arith.mulf %20, %26 : vector<2x32xf32>
    %c0_11 = arith.constant 0 : index
    %c0_12 = arith.constant 0 : index
    %28 = vector.load %arg9[%c0_11, %c0_12] : memref<16x32xf32, #tpu.memory_space<vmem>>, vector<2x32xf32>
    tpu.vector_store %arg9[%c0_11, %c0_12], %27 {strides = array<i32>} : memref<16x32xf32, #tpu.memory_space<vmem>>, vector<2x32xf32>,
    %29 = vector.extract_strided_slice %7 {offsets = [2, 0], sizes = [2, 128], strides = [1, 1]} : vector<16x128xf32> to vector<2x128xf32>
    %cst_13 = arith.constant dense<0.000000e+00> : vector<2x128xf32>
    %30 = tpu.matmul %27, %1, %cst_13 {dimension_numbers = #tpu.dot_dimension_numbers<[1], [0], [0], [1], [0, 0, 1, 1], [], []>} : vector<2x32xf32>, vector<32x128xf32>, vector<2x128xf32> -> vector<2x128xf32>
    %31 = arith.addf %29, %30 : vector<2x128xf32>
    %32 = arith.negf %31 : vector<2x128xf32>
    %33 = math.exp %32 : vector<2x128xf32>
    %cst_14 = arith.constant 1.000000e+00 : f32
    %34 = vector.broadcast %cst_14 : f32 to vector<2x128xf32>
    %35 = arith.addf %34, %33 : vector<2x128xf32>
    %36 = arith.divf %34, %35 : vector<2x128xf32>
    %37 = vector.extract_strided_slice %36 {offsets = [0, 0], sizes = [2, 32], strides = [1, 1]} : vector<2x128xf32> to vector<2x32xf32>
    %38 = vector.extract_strided_slice %36 {offsets = [0, 32], sizes = [2, 32], strides = [1, 1]} : vector<2x128xf32> to vector<2x32xf32>
    %39 = vector.extract_strided_slice %36 {offsets = [0, 96], sizes = [2, 32], strides = [1, 1]} : vector<2x128xf32> to vector<2x32xf32>
    %40 = vector.extract_strided_slice %31 {offsets = [0, 64], sizes = [2, 32], strides = [1, 1]} : vector<2x128xf32> to vector<2x32xf32>
    %41 = math.tanh %40 : vector<2x32xf32>
    %42 = arith.mulf %38, %25 : vector<2x32xf32>
    %43 = arith.mulf %37, %41 : vector<2x32xf32>
    %44 = arith.addf %42, %43 : vector<2x32xf32>
    %45 = math.tanh %44 : vector<2x32xf32>
    %46 = arith.mulf %39, %45 : vector<2x32xf32>
    %c2 = arith.constant 2 : index
    %c0_15 = arith.constant 0 : index
    %47 = vector.load %arg9[%c2, %c0_15] : memref<16x32xf32, #tpu.memory_space<vmem>>, vector<2x32xf32>
    tpu.vector_store %arg9[%c2, %c0_15], %46 {strides = array<i32>} : memref<16x32xf32, #tpu.memory_space<vmem>>, vector<2x32xf32>,
    %48 = vector.extract_strided_slice %7 {offsets = [4, 0], sizes = [2, 128], strides = [1, 1]} : vector<16x128xf32> to vector<2x128xf32>
    %cst_16 = arith.constant dense<0.000000e+00> : vector<2x128xf32>
    %49 = tpu.matmul %46, %1, %cst_16 {dimension_numbers = #tpu.dot_dimension_numbers<[1], [0], [0], [1], [0, 0, 1, 1], [], []>} : vector<2x32xf32>, vector<32x128xf32>, vector<2x128xf32> -> vector<2x128xf32>
    %50 = arith.addf %48, %49 : vector<2x128xf32>
    %51 = arith.negf %50 : vector<2x128xf32>
    %52 = math.exp %51 : vector<2x128xf32>
    %cst_17 = arith.constant 1.000000e+00 : f32
    %53 = vector.broadcast %cst_17 : f32 to vector<2x128xf32>
    %54 = arith.addf %53, %52 : vector<2x128xf32>
    %55 = arith.divf %53, %54 : vector<2x128xf32>
    %56 = vector.extract_strided_slice %55 {offsets = [0, 0], sizes = [2, 32], strides = [1, 1]} : vector<2x128xf32> to vector<2x32xf32>
    %57 = vector.extract_strided_slice %55 {offsets = [0, 32], sizes = [2, 32], strides = [1, 1]} : vector<2x128xf32> to vector<2x32xf32>
    %58 = vector.extract_strided_slice %55 {offsets = [0, 96], sizes = [2, 32], strides = [1, 1]} : vector<2x128xf32> to vector<2x32xf32>
    %59 = vector.extract_strided_slice %50 {offsets = [0, 64], sizes = [2, 32], strides = [1, 1]} : vector<2x128xf32> to vector<2x32xf32>
    %60 = math.tanh %59 : vector<2x32xf32>
    %61 = arith.mulf %57, %44 : vector<2x32xf32>
    %62 = arith.mulf %56, %60 : vector<2x32xf32>
    %63 = arith.addf %61, %62 : vector<2x32xf32>
    %64 = math.tanh %63 : vector<2x32xf32>
    %65 = arith.mulf %58, %64 : vector<2x32xf32>
    %c4 = arith.constant 4 : index
    %c0_18 = arith.constant 0 : index
    %66 = vector.load %arg9[%c4, %c0_18] : memref<16x32xf32, #tpu.memory_space<vmem>>, vector<2x32xf32>
    tpu.vector_store %arg9[%c4, %c0_18], %65 {strides = array<i32>} : memref<16x32xf32, #tpu.memory_space<vmem>>, vector<2x32xf32>,
    %67 = vector.extract_strided_slice %7 {offsets = [6, 0], sizes = [2, 128], strides = [1, 1]} : vector<16x128xf32> to vector<2x128xf32>
    %cst_19 = arith.constant dense<0.000000e+00> : vector<2x128xf32>
    %68 = tpu.matmul %65, %1, %cst_19 {dimension_numbers = #tpu.dot_dimension_numbers<[1], [0], [0], [1], [0, 0, 1, 1], [], []>} : vector<2x32xf32>, vector<32x128xf32>, vector<2x128xf32> -> vector<2x128xf32>
    %69 = arith.addf %67, %68 : vector<2x128xf32>
    %70 = arith.negf %69 : vector<2x128xf32>
    %71 = math.exp %70 : vector<2x128xf32>
    %cst_20 = arith.constant 1.000000e+00 : f32
    %72 = vector.broadcast %cst_20 : f32 to vector<2x128xf32>
    %73 = arith.addf %72, %71 : vector<2x128xf32>
    %74 = arith.divf %72, %73 : vector<2x128xf32>
    %75 = vector.extract_strided_slice %74 {offsets = [0, 0], sizes = [2, 32], strides = [1, 1]} : vector<2x128xf32> to vector<2x32xf32>
    %76 = vector.extract_strided_slice %74 {offsets = [0, 32], sizes = [2, 32], strides = [1, 1]} : vector<2x128xf32> to vector<2x32xf32>
    %77 = vector.extract_strided_slice %74 {offsets = [0, 96], sizes = [2, 32], strides = [1, 1]} : vector<2x128xf32> to vector<2x32xf32>
    %78 = vector.extract_strided_slice %69 {offsets = [0, 64], sizes = [2, 32], strides = [1, 1]} : vector<2x128xf32> to vector<2x32xf32>
    %79 = math.tanh %78 : vector<2x32xf32>
    %80 = arith.mulf %76, %63 : vector<2x32xf32>
    %81 = arith.mulf %75, %79 : vector<2x32xf32>
    %82 = arith.addf %80, %81 : vector<2x32xf32>
    %83 = math.tanh %82 : vector<2x32xf32>
    %84 = arith.mulf %77, %83 : vector<2x32xf32>
    %c6 = arith.constant 6 : index
    %c0_21 = arith.constant 0 : index
    %85 = vector.load %arg9[%c6, %c0_21] : memref<16x32xf32, #tpu.memory_space<vmem>>, vector<2x32xf32>
    tpu.vector_store %arg9[%c6, %c0_21], %84 {strides = array<i32>} : memref<16x32xf32, #tpu.memory_space<vmem>>, vector<2x32xf32>,
    %86 = vector.extract_strided_slice %7 {offsets = [8, 0], sizes = [2, 128], strides = [1, 1]} : vector<16x128xf32> to vector<2x128xf32>
    %cst_22 = arith.constant dense<0.000000e+00> : vector<2x128xf32>
    %87 = tpu.matmul %84, %1, %cst_22 {dimension_numbers = #tpu.dot_dimension_numbers<[1], [0], [0], [1], [0, 0, 1, 1], [], []>} : vector<2x32xf32>, vector<32x128xf32>, vector<2x128xf32> -> vector<2x128xf32>
    %88 = arith.addf %86, %87 : vector<2x128xf32>
    %89 = arith.negf %88 : vector<2x128xf32>
    %90 = math.exp %89 : vector<2x128xf32>
    %cst_23 = arith.constant 1.000000e+00 : f32
    %91 = vector.broadcast %cst_23 : f32 to vector<2x128xf32>
    %92 = arith.addf %91, %90 : vector<2x128xf32>
    %93 = arith.divf %91, %92 : vector<2x128xf32>
    %94 = vector.extract_strided_slice %93 {offsets = [0, 0], sizes = [2, 32], strides = [1, 1]} : vector<2x128xf32> to vector<2x32xf32>
    %95 = vector.extract_strided_slice %93 {offsets = [0, 32], sizes = [2, 32], strides = [1, 1]} : vector<2x128xf32> to vector<2x32xf32>
    %96 = vector.extract_strided_slice %93 {offsets = [0, 96], sizes = [2, 32], strides = [1, 1]} : vector<2x128xf32> to vector<2x32xf32>
    %97 = vector.extract_strided_slice %88 {offsets = [0, 64], sizes = [2, 32], strides = [1, 1]} : vector<2x128xf32> to vector<2x32xf32>
    %98 = math.tanh %97 : vector<2x32xf32>
    %99 = arith.mulf %95, %82 : vector<2x32xf32>
    %100 = arith.mulf %94, %98 : vector<2x32xf32>
    %101 = arith.addf %99, %100 : vector<2x32xf32>
    %102 = math.tanh %101 : vector<2x32xf32>
    %103 = arith.mulf %96, %102 : vector<2x32xf32>
    %c8 = arith.constant 8 : index
    %c0_24 = arith.constant 0 : index
    %104 = vector.load %arg9[%c8, %c0_24] : memref<16x32xf32, #tpu.memory_space<vmem>>, vector<2x32xf32>
    tpu.vector_store %arg9[%c8, %c0_24], %103 {strides = array<i32>} : memref<16x32xf32, #tpu.memory_space<vmem>>, vector<2x32xf32>,
    %105 = vector.extract_strided_slice %7 {offsets = [10, 0], sizes = [2, 128], strides = [1, 1]} : vector<16x128xf32> to vector<2x128xf32>
    %cst_25 = arith.constant dense<0.000000e+00> : vector<2x128xf32>
    %106 = tpu.matmul %103, %1, %cst_25 {dimension_numbers = #tpu.dot_dimension_numbers<[1], [0], [0], [1], [0, 0, 1, 1], [], []>} : vector<2x32xf32>, vector<32x128xf32>, vector<2x128xf32> -> vector<2x128xf32>
    %107 = arith.addf %105, %106 : vector<2x128xf32>
    %108 = arith.negf %107 : vector<2x128xf32>
    %109 = math.exp %108 : vector<2x128xf32>
    %cst_26 = arith.constant 1.000000e+00 : f32
    %110 = vector.broadcast %cst_26 : f32 to vector<2x128xf32>
    %111 = arith.addf %110, %109 : vector<2x128xf32>
    %112 = arith.divf %110, %111 : vector<2x128xf32>
    %113 = vector.extract_strided_slice %112 {offsets = [0, 0], sizes = [2, 32], strides = [1, 1]} : vector<2x128xf32> to vector<2x32xf32>
    %114 = vector.extract_strided_slice %112 {offsets = [0, 32], sizes = [2, 32], strides = [1, 1]} : vector<2x128xf32> to vector<2x32xf32>
    %115 = vector.extract_strided_slice %112 {offsets = [0, 96], sizes = [2, 32], strides = [1, 1]} : vector<2x128xf32> to vector<2x32xf32>
    %116 = vector.extract_strided_slice %107 {offsets = [0, 64], sizes = [2, 32], strides = [1, 1]} : vector<2x128xf32> to vector<2x32xf32>
    %117 = math.tanh %116 : vector<2x32xf32>
    %118 = arith.mulf %114, %101 : vector<2x32xf32>
    %119 = arith.mulf %113, %117 : vector<2x32xf32>
    %120 = arith.addf %118, %119 : vector<2x32xf32>
    %121 = math.tanh %120 : vector<2x32xf32>
    %122 = arith.mulf %115, %121 : vector<2x32xf32>
    %c10 = arith.constant 10 : index
    %c0_27 = arith.constant 0 : index
    %123 = vector.load %arg9[%c10, %c0_27] : memref<16x32xf32, #tpu.memory_space<vmem>>, vector<2x32xf32>
    tpu.vector_store %arg9[%c10, %c0_27], %122 {strides = array<i32>} : memref<16x32xf32, #tpu.memory_space<vmem>>, vector<2x32xf32>,
    %124 = vector.extract_strided_slice %7 {offsets = [12, 0], sizes = [2, 128], strides = [1, 1]} : vector<16x128xf32> to vector<2x128xf32>
    %cst_28 = arith.constant dense<0.000000e+00> : vector<2x128xf32>
    %125 = tpu.matmul %122, %1, %cst_28 {dimension_numbers = #tpu.dot_dimension_numbers<[1], [0], [0], [1], [0, 0, 1, 1], [], []>} : vector<2x32xf32>, vector<32x128xf32>, vector<2x128xf32> -> vector<2x128xf32>
    %126 = arith.addf %124, %125 : vector<2x128xf32>
    %127 = arith.negf %126 : vector<2x128xf32>
    %128 = math.exp %127 : vector<2x128xf32>
    %cst_29 = arith.constant 1.000000e+00 : f32
    %129 = vector.broadcast %cst_29 : f32 to vector<2x128xf32>
    %130 = arith.addf %129, %128 : vector<2x128xf32>
    %131 = arith.divf %129, %130 : vector<2x128xf32>
    %132 = vector.extract_strided_slice %131 {offsets = [0, 0], sizes = [2, 32], strides = [1, 1]} : vector<2x128xf32> to vector<2x32xf32>
    %133 = vector.extract_strided_slice %131 {offsets = [0, 32], sizes = [2, 32], strides = [1, 1]} : vector<2x128xf32> to vector<2x32xf32>
    %134 = vector.extract_strided_slice %131 {offsets = [0, 96], sizes = [2, 32], strides = [1, 1]} : vector<2x128xf32> to vector<2x32xf32>
    %135 = vector.extract_strided_slice %126 {offsets = [0, 64], sizes = [2, 32], strides = [1, 1]} : vector<2x128xf32> to vector<2x32xf32>
    %136 = math.tanh %135 : vector<2x32xf32>
    %137 = arith.mulf %133, %120 : vector<2x32xf32>
    %138 = arith.mulf %132, %136 : vector<2x32xf32>
    %139 = arith.addf %137, %138 : vector<2x32xf32>
    %140 = math.tanh %139 : vector<2x32xf32>
    %141 = arith.mulf %134, %140 : vector<2x32xf32>
    %c12 = arith.constant 12 : index
    %c0_30 = arith.constant 0 : index
    %142 = vector.load %arg9[%c12, %c0_30] : memref<16x32xf32, #tpu.memory_space<vmem>>, vector<2x32xf32>
    tpu.vector_store %arg9[%c12, %c0_30], %141 {strides = array<i32>} : memref<16x32xf32, #tpu.memory_space<vmem>>, vector<2x32xf32>,
    %143 = vector.extract_strided_slice %7 {offsets = [14, 0], sizes = [2, 128], strides = [1, 1]} : vector<16x128xf32> to vector<2x128xf32>
    %cst_31 = arith.constant dense<0.000000e+00> : vector<2x128xf32>
    %144 = tpu.matmul %141, %1, %cst_31 {dimension_numbers = #tpu.dot_dimension_numbers<[1], [0], [0], [1], [0, 0, 1, 1], [], []>} : vector<2x32xf32>, vector<32x128xf32>, vector<2x128xf32> -> vector<2x128xf32>
    %145 = arith.addf %143, %144 : vector<2x128xf32>
    %146 = arith.negf %145 : vector<2x128xf32>
    %147 = math.exp %146 : vector<2x128xf32>
    %cst_32 = arith.constant 1.000000e+00 : f32
    %148 = vector.broadcast %cst_32 : f32 to vector<2x128xf32>
    %149 = arith.addf %148, %147 : vector<2x128xf32>
    %150 = arith.divf %148, %149 : vector<2x128xf32>
    %151 = vector.extract_strided_slice %150 {offsets = [0, 0], sizes = [2, 32], strides = [1, 1]} : vector<2x128xf32> to vector<2x32xf32>
    %152 = vector.extract_strided_slice %150 {offsets = [0, 32], sizes = [2, 32], strides = [1, 1]} : vector<2x128xf32> to vector<2x32xf32>
    %153 = vector.extract_strided_slice %150 {offsets = [0, 96], sizes = [2, 32], strides = [1, 1]} : vector<2x128xf32> to vector<2x32xf32>
    %154 = vector.extract_strided_slice %145 {offsets = [0, 64], sizes = [2, 32], strides = [1, 1]} : vector<2x128xf32> to vector<2x32xf32>
    %155 = math.tanh %154 : vector<2x32xf32>
    %156 = arith.mulf %152, %139 : vector<2x32xf32>
    %157 = arith.mulf %151, %155 : vector<2x32xf32>
    %158 = arith.addf %156, %157 : vector<2x32xf32>
    %159 = math.tanh %158 : vector<2x32xf32>
    %160 = arith.mulf %153, %159 : vector<2x32xf32>
    %c14 = arith.constant 14 : index
    %c0_33 = arith.constant 0 : index
    %161 = vector.load %arg9[%c14, %c0_33] : memref<16x32xf32, #tpu.memory_space<vmem>>, vector<2x32xf32>
    tpu.vector_store %arg9[%c14, %c0_33], %160 {strides = array<i32>} : memref<16x32xf32, #tpu.memory_space<vmem>>, vector<2x32xf32>,
    %c0_34 = arith.constant 0 : index
    %c0_35 = arith.constant 0 : index
    %162 = vector.load %arg4[%c0_34, %c0_35] : memref<32x128xf32, #tpu.memory_space<vmem>>, vector<32x128xf32>
    %c0_36 = arith.constant 0 : index
    %c0_37 = arith.constant 0 : index
    %163 = vector.load %arg5[%c0_36, %c0_37] : memref<32x128xf32, #tpu.memory_space<vmem>>, vector<32x128xf32>
    %c0_38 = arith.constant 0 : index
    %c0_39 = arith.constant 0 : index
    %164 = vector.load %arg9[%c0_38, %c0_39] : memref<16x32xf32, #tpu.memory_space<vmem>>, vector<16x32xf32>
    %cst_40 = arith.constant dense<0.000000e+00> : vector<16x128xf32>
    %165 = tpu.matmul %164, %162, %cst_40 {dimension_numbers = #tpu.dot_dimension_numbers<[1], [0], [0], [1], [0, 0, 1, 1], [], []>} : vector<16x32xf32>, vector<32x128xf32>, vector<16x128xf32> -> vector<16x128xf32>
    %c0_41 = arith.constant 0 : index
    %c0_42 = arith.constant 0 : index
    %166 = vector.load %arg6[%c0_41, %c0_42] : memref<1x128xf32, #tpu.memory_space<vmem>>, vector<1x128xf32>
    %167 = vector.shape_cast %166 : vector<1x128xf32> to vector<1x128xf32>
    %168 = vector.broadcast %167 : vector<1x128xf32> to vector<16x128xf32>
    %169 = arith.addf %165, %168 : vector<16x128xf32>
    %cst_43 = arith.constant 0.000000e+00 : f32
    %170 = vector.broadcast %cst_43 : f32 to vector<2x32xf32>
    %cst_44 = arith.constant 0.000000e+00 : f32
    %171 = vector.broadcast %cst_44 : f32 to vector<2x32xf32>
    %172 = vector.extract_strided_slice %169 {offsets = [0, 0], sizes = [2, 128], strides = [1, 1]} : vector<16x128xf32> to vector<2x128xf32>
    %cst_45 = arith.constant dense<0.000000e+00> : vector<2x128xf32>
    %173 = tpu.matmul %170, %163, %cst_45 {dimension_numbers = #tpu.dot_dimension_numbers<[1], [0], [0], [1], [0, 0, 1, 1], [], []>} : vector<2x32xf32>, vector<32x128xf32>, vector<2x128xf32> -> vector<2x128xf32>
    %174 = arith.addf %172, %173 : vector<2x128xf32>
    %175 = arith.negf %174 : vector<2x128xf32>
    %176 = math.exp %175 : vector<2x128xf32>
    %cst_46 = arith.constant 1.000000e+00 : f32
    %177 = vector.broadcast %cst_46 : f32 to vector<2x128xf32>
    %178 = arith.addf %177, %176 : vector<2x128xf32>
    %179 = arith.divf %177, %178 : vector<2x128xf32>
    %180 = vector.extract_strided_slice %179 {offsets = [0, 0], sizes = [2, 32], strides = [1, 1]} : vector<2x128xf32> to vector<2x32xf32>
    %181 = vector.extract_strided_slice %179 {offsets = [0, 32], sizes = [2, 32], strides = [1, 1]} : vector<2x128xf32> to vector<2x32xf32>
    %182 = vector.extract_strided_slice %179 {offsets = [0, 96], sizes = [2, 32], strides = [1, 1]} : vector<2x128xf32> to vector<2x32xf32>
    %183 = vector.extract_strided_slice %174 {offsets = [0, 64], sizes = [2, 32], strides = [1, 1]} : vector<2x128xf32> to vector<2x32xf32>
    %184 = math.tanh %183 : vector<2x32xf32>
    %185 = arith.mulf %181, %171 : vector<2x32xf32>
    %186 = arith.mulf %180, %184 : vector<2x32xf32>
    %187 = arith.addf %185, %186 : vector<2x32xf32>
    %188 = math.tanh %187 : vector<2x32xf32>
    %189 = arith.mulf %182, %188 : vector<2x32xf32>
    %190 = vector.extract_strided_slice %169 {offsets = [2, 0], sizes = [2, 128], strides = [1, 1]} : vector<16x128xf32> to vector<2x128xf32>
    %cst_47 = arith.constant dense<0.000000e+00> : vector<2x128xf32>
    %191 = tpu.matmul %189, %163, %cst_47 {dimension_numbers = #tpu.dot_dimension_numbers<[1], [0], [0], [1], [0, 0, 1, 1], [], []>} : vector<2x32xf32>, vector<32x128xf32>, vector<2x128xf32> -> vector<2x128xf32>
    %192 = arith.addf %190, %191 : vector<2x128xf32>
    %193 = arith.negf %192 : vector<2x128xf32>
    %194 = math.exp %193 : vector<2x128xf32>
    %cst_48 = arith.constant 1.000000e+00 : f32
    %195 = vector.broadcast %cst_48 : f32 to vector<2x128xf32>
    %196 = arith.addf %195, %194 : vector<2x128xf32>
    %197 = arith.divf %195, %196 : vector<2x128xf32>
    %198 = vector.extract_strided_slice %197 {offsets = [0, 0], sizes = [2, 32], strides = [1, 1]} : vector<2x128xf32> to vector<2x32xf32>
    %199 = vector.extract_strided_slice %197 {offsets = [0, 32], sizes = [2, 32], strides = [1, 1]} : vector<2x128xf32> to vector<2x32xf32>
    %200 = vector.extract_strided_slice %197 {offsets = [0, 96], sizes = [2, 32], strides = [1, 1]} : vector<2x128xf32> to vector<2x32xf32>
    %201 = vector.extract_strided_slice %192 {offsets = [0, 64], sizes = [2, 32], strides = [1, 1]} : vector<2x128xf32> to vector<2x32xf32>
    %202 = math.tanh %201 : vector<2x32xf32>
    %203 = arith.mulf %199, %187 : vector<2x32xf32>
    %204 = arith.mulf %198, %202 : vector<2x32xf32>
    %205 = arith.addf %203, %204 : vector<2x32xf32>
    %206 = math.tanh %205 : vector<2x32xf32>
    %207 = arith.mulf %200, %206 : vector<2x32xf32>
    %208 = vector.extract_strided_slice %169 {offsets = [4, 0], sizes = [2, 128], strides = [1, 1]} : vector<16x128xf32> to vector<2x128xf32>
    %cst_49 = arith.constant dense<0.000000e+00> : vector<2x128xf32>
    %209 = tpu.matmul %207, %163, %cst_49 {dimension_numbers = #tpu.dot_dimension_numbers<[1], [0], [0], [1], [0, 0, 1, 1], [], []>} : vector<2x32xf32>, vector<32x128xf32>, vector<2x128xf32> -> vector<2x128xf32>
    %210 = arith.addf %208, %209 : vector<2x128xf32>
    %211 = arith.negf %210 : vector<2x128xf32>
    %212 = math.exp %211 : vector<2x128xf32>
    %cst_50 = arith.constant 1.000000e+00 : f32
    %213 = vector.broadcast %cst_50 : f32 to vector<2x128xf32>
    %214 = arith.addf %213, %212 : vector<2x128xf32>
    %215 = arith.divf %213, %214 : vector<2x128xf32>
    %216 = vector.extract_strided_slice %215 {offsets = [0, 0], sizes = [2, 32], strides = [1, 1]} : vector<2x128xf32> to vector<2x32xf32>
    %217 = vector.extract_strided_slice %215 {offsets = [0, 32], sizes = [2, 32], strides = [1, 1]} : vector<2x128xf32> to vector<2x32xf32>
    %218 = vector.extract_strided_slice %215 {offsets = [0, 96], sizes = [2, 32], strides = [1, 1]} : vector<2x128xf32> to vector<2x32xf32>
    %219 = vector.extract_strided_slice %210 {offsets = [0, 64], sizes = [2, 32], strides = [1, 1]} : vector<2x128xf32> to vector<2x32xf32>
    %220 = math.tanh %219 : vector<2x32xf32>
    %221 = arith.mulf %217, %205 : vector<2x32xf32>
    %222 = arith.mulf %216, %220 : vector<2x32xf32>
    %223 = arith.addf %221, %222 : vector<2x32xf32>
    %224 = math.tanh %223 : vector<2x32xf32>
    %225 = arith.mulf %218, %224 : vector<2x32xf32>
    %226 = vector.extract_strided_slice %169 {offsets = [6, 0], sizes = [2, 128], strides = [1, 1]} : vector<16x128xf32> to vector<2x128xf32>
    %cst_51 = arith.constant dense<0.000000e+00> : vector<2x128xf32>
    %227 = tpu.matmul %225, %163, %cst_51 {dimension_numbers = #tpu.dot_dimension_numbers<[1], [0], [0], [1], [0, 0, 1, 1], [], []>} : vector<2x32xf32>, vector<32x128xf32>, vector<2x128xf32> -> vector<2x128xf32>
    %228 = arith.addf %226, %227 : vector<2x128xf32>
    %229 = arith.negf %228 : vector<2x128xf32>
    %230 = math.exp %229 : vector<2x128xf32>
    %cst_52 = arith.constant 1.000000e+00 : f32
    %231 = vector.broadcast %cst_52 : f32 to vector<2x128xf32>
    %232 = arith.addf %231, %230 : vector<2x128xf32>
    %233 = arith.divf %231, %232 : vector<2x128xf32>
    %234 = vector.extract_strided_slice %233 {offsets = [0, 0], sizes = [2, 32], strides = [1, 1]} : vector<2x128xf32> to vector<2x32xf32>
    %235 = vector.extract_strided_slice %233 {offsets = [0, 32], sizes = [2, 32], strides = [1, 1]} : vector<2x128xf32> to vector<2x32xf32>
    %236 = vector.extract_strided_slice %233 {offsets = [0, 96], sizes = [2, 32], strides = [1, 1]} : vector<2x128xf32> to vector<2x32xf32>
    %237 = vector.extract_strided_slice %228 {offsets = [0, 64], sizes = [2, 32], strides = [1, 1]} : vector<2x128xf32> to vector<2x32xf32>
    %238 = math.tanh %237 : vector<2x32xf32>
    %239 = arith.mulf %235, %223 : vector<2x32xf32>
    %240 = arith.mulf %234, %238 : vector<2x32xf32>
    %241 = arith.addf %239, %240 : vector<2x32xf32>
    %242 = math.tanh %241 : vector<2x32xf32>
    %243 = arith.mulf %236, %242 : vector<2x32xf32>
    %244 = vector.extract_strided_slice %169 {offsets = [8, 0], sizes = [2, 128], strides = [1, 1]} : vector<16x128xf32> to vector<2x128xf32>
    %cst_53 = arith.constant dense<0.000000e+00> : vector<2x128xf32>
    %245 = tpu.matmul %243, %163, %cst_53 {dimension_numbers = #tpu.dot_dimension_numbers<[1], [0], [0], [1], [0, 0, 1, 1], [], []>} : vector<2x32xf32>, vector<32x128xf32>, vector<2x128xf32> -> vector<2x128xf32>
    %246 = arith.addf %244, %245 : vector<2x128xf32>
    %247 = arith.negf %246 : vector<2x128xf32>
    %248 = math.exp %247 : vector<2x128xf32>
    %cst_54 = arith.constant 1.000000e+00 : f32
    %249 = vector.broadcast %cst_54 : f32 to vector<2x128xf32>
    %250 = arith.addf %249, %248 : vector<2x128xf32>
    %251 = arith.divf %249, %250 : vector<2x128xf32>
    %252 = vector.extract_strided_slice %251 {offsets = [0, 0], sizes = [2, 32], strides = [1, 1]} : vector<2x128xf32> to vector<2x32xf32>
    %253 = vector.extract_strided_slice %251 {offsets = [0, 32], sizes = [2, 32], strides = [1, 1]} : vector<2x128xf32> to vector<2x32xf32>
    %254 = vector.extract_strided_slice %251 {offsets = [0, 96], sizes = [2, 32], strides = [1, 1]} : vector<2x128xf32> to vector<2x32xf32>
    %255 = vector.extract_strided_slice %246 {offsets = [0, 64], sizes = [2, 32], strides = [1, 1]} : vector<2x128xf32> to vector<2x32xf32>
    %256 = math.tanh %255 : vector<2x32xf32>
    %257 = arith.mulf %253, %241 : vector<2x32xf32>
    %258 = arith.mulf %252, %256 : vector<2x32xf32>
    %259 = arith.addf %257, %258 : vector<2x32xf32>
    %260 = math.tanh %259 : vector<2x32xf32>
    %261 = arith.mulf %254, %260 : vector<2x32xf32>
    %262 = vector.extract_strided_slice %169 {offsets = [10, 0], sizes = [2, 128], strides = [1, 1]} : vector<16x128xf32> to vector<2x128xf32>
    %cst_55 = arith.constant dense<0.000000e+00> : vector<2x128xf32>
    %263 = tpu.matmul %261, %163, %cst_55 {dimension_numbers = #tpu.dot_dimension_numbers<[1], [0], [0], [1], [0, 0, 1, 1], [], []>} : vector<2x32xf32>, vector<32x128xf32>, vector<2x128xf32> -> vector<2x128xf32>
    %264 = arith.addf %262, %263 : vector<2x128xf32>
    %265 = arith.negf %264 : vector<2x128xf32>
    %266 = math.exp %265 : vector<2x128xf32>
    %cst_56 = arith.constant 1.000000e+00 : f32
    %267 = vector.broadcast %cst_56 : f32 to vector<2x128xf32>
    %268 = arith.addf %267, %266 : vector<2x128xf32>
    %269 = arith.divf %267, %268 : vector<2x128xf32>
    %270 = vector.extract_strided_slice %269 {offsets = [0, 0], sizes = [2, 32], strides = [1, 1]} : vector<2x128xf32> to vector<2x32xf32>
    %271 = vector.extract_strided_slice %269 {offsets = [0, 32], sizes = [2, 32], strides = [1, 1]} : vector<2x128xf32> to vector<2x32xf32>
    %272 = vector.extract_strided_slice %269 {offsets = [0, 96], sizes = [2, 32], strides = [1, 1]} : vector<2x128xf32> to vector<2x32xf32>
    %273 = vector.extract_strided_slice %264 {offsets = [0, 64], sizes = [2, 32], strides = [1, 1]} : vector<2x128xf32> to vector<2x32xf32>
    %274 = math.tanh %273 : vector<2x32xf32>
    %275 = arith.mulf %271, %259 : vector<2x32xf32>
    %276 = arith.mulf %270, %274 : vector<2x32xf32>
    %277 = arith.addf %275, %276 : vector<2x32xf32>
    %278 = math.tanh %277 : vector<2x32xf32>
    %279 = arith.mulf %272, %278 : vector<2x32xf32>
    %280 = vector.extract_strided_slice %169 {offsets = [12, 0], sizes = [2, 128], strides = [1, 1]} : vector<16x128xf32> to vector<2x128xf32>
    %cst_57 = arith.constant dense<0.000000e+00> : vector<2x128xf32>
    %281 = tpu.matmul %279, %163, %cst_57 {dimension_numbers = #tpu.dot_dimension_numbers<[1], [0], [0], [1], [0, 0, 1, 1], [], []>} : vector<2x32xf32>, vector<32x128xf32>, vector<2x128xf32> -> vector<2x128xf32>
    %282 = arith.addf %280, %281 : vector<2x128xf32>
    %283 = arith.negf %282 : vector<2x128xf32>
    %284 = math.exp %283 : vector<2x128xf32>
    %cst_58 = arith.constant 1.000000e+00 : f32
    %285 = vector.broadcast %cst_58 : f32 to vector<2x128xf32>
    %286 = arith.addf %285, %284 : vector<2x128xf32>
    %287 = arith.divf %285, %286 : vector<2x128xf32>
    %288 = vector.extract_strided_slice %287 {offsets = [0, 0], sizes = [2, 32], strides = [1, 1]} : vector<2x128xf32> to vector<2x32xf32>
    %289 = vector.extract_strided_slice %287 {offsets = [0, 32], sizes = [2, 32], strides = [1, 1]} : vector<2x128xf32> to vector<2x32xf32>
    %290 = vector.extract_strided_slice %287 {offsets = [0, 96], sizes = [2, 32], strides = [1, 1]} : vector<2x128xf32> to vector<2x32xf32>
    %291 = vector.extract_strided_slice %282 {offsets = [0, 64], sizes = [2, 32], strides = [1, 1]} : vector<2x128xf32> to vector<2x32xf32>
    %292 = math.tanh %291 : vector<2x32xf32>
    %293 = arith.mulf %289, %277 : vector<2x32xf32>
    %294 = arith.mulf %288, %292 : vector<2x32xf32>
    %295 = arith.addf %293, %294 : vector<2x32xf32>
    %296 = math.tanh %295 : vector<2x32xf32>
    %297 = arith.mulf %290, %296 : vector<2x32xf32>
    %298 = vector.extract_strided_slice %169 {offsets = [14, 0], sizes = [2, 128], strides = [1, 1]} : vector<16x128xf32> to vector<2x128xf32>
    %cst_59 = arith.constant dense<0.000000e+00> : vector<2x128xf32>
    %299 = tpu.matmul %297, %163, %cst_59 {dimension_numbers = #tpu.dot_dimension_numbers<[1], [0], [0], [1], [0, 0, 1, 1], [], []>} : vector<2x32xf32>, vector<32x128xf32>, vector<2x128xf32> -> vector<2x128xf32>
    %300 = arith.addf %298, %299 : vector<2x128xf32>
    %301 = arith.negf %300 : vector<2x128xf32>
    %302 = math.exp %301 : vector<2x128xf32>
    %cst_60 = arith.constant 1.000000e+00 : f32
    %303 = vector.broadcast %cst_60 : f32 to vector<2x128xf32>
    %304 = arith.addf %303, %302 : vector<2x128xf32>
    %305 = arith.divf %303, %304 : vector<2x128xf32>
    %306 = vector.extract_strided_slice %305 {offsets = [0, 0], sizes = [2, 32], strides = [1, 1]} : vector<2x128xf32> to vector<2x32xf32>
    %307 = vector.extract_strided_slice %305 {offsets = [0, 32], sizes = [2, 32], strides = [1, 1]} : vector<2x128xf32> to vector<2x32xf32>
    %308 = vector.extract_strided_slice %305 {offsets = [0, 96], sizes = [2, 32], strides = [1, 1]} : vector<2x128xf32> to vector<2x32xf32>
    %309 = vector.extract_strided_slice %300 {offsets = [0, 64], sizes = [2, 32], strides = [1, 1]} : vector<2x128xf32> to vector<2x32xf32>
    %310 = math.tanh %309 : vector<2x32xf32>
    %311 = arith.mulf %307, %295 : vector<2x32xf32>
    %312 = arith.mulf %306, %310 : vector<2x32xf32>
    %313 = arith.addf %311, %312 : vector<2x32xf32>
    %314 = math.tanh %313 : vector<2x32xf32>
    %315 = arith.mulf %308, %314 : vector<2x32xf32>
    %cst_61 = arith.constant 0.000000e+00 : f32
    %316 = vector.broadcast %cst_61 : f32 to vector<2x12xf32>
    %c0_62 = arith.constant 0 : index
    %c0_63 = arith.constant 0 : index
    %317 = vector.load %arg7[%c0_62, %c0_63] : memref<256x12xf32, #tpu.memory_space<vmem>>, vector<32x12xf32>
    %cst_64 = arith.constant dense<0.000000e+00> : vector<2x12xf32>
    %318 = tpu.matmul %189, %317, %cst_64 {dimension_numbers = #tpu.dot_dimension_numbers<[1], [0], [0], [1], [0, 0, 1, 1], [], []>} : vector<2x32xf32>, vector<32x12xf32>, vector<2x12xf32> -> vector<2x12xf32>
    %319 = arith.addf %316, %318 : vector<2x12xf32>
    %c32 = arith.constant 32 : index
    %c0_65 = arith.constant 0 : index
    %320 = vector.load %arg7[%c32, %c0_65] : memref<256x12xf32, #tpu.memory_space<vmem>>, vector<32x12xf32>
    %cst_66 = arith.constant dense<0.000000e+00> : vector<2x12xf32>
    %321 = tpu.matmul %207, %320, %cst_66 {dimension_numbers = #tpu.dot_dimension_numbers<[1], [0], [0], [1], [0, 0, 1, 1], [], []>} : vector<2x32xf32>, vector<32x12xf32>, vector<2x12xf32> -> vector<2x12xf32>
    %322 = arith.addf %319, %321 : vector<2x12xf32>
    %c64 = arith.constant 64 : index
    %c0_67 = arith.constant 0 : index
    %323 = vector.load %arg7[%c64, %c0_67] : memref<256x12xf32, #tpu.memory_space<vmem>>, vector<32x12xf32>
    %cst_68 = arith.constant dense<0.000000e+00> : vector<2x12xf32>
    %324 = tpu.matmul %225, %323, %cst_68 {dimension_numbers = #tpu.dot_dimension_numbers<[1], [0], [0], [1], [0, 0, 1, 1], [], []>} : vector<2x32xf32>, vector<32x12xf32>, vector<2x12xf32> -> vector<2x12xf32>
    %325 = arith.addf %322, %324 : vector<2x12xf32>
    %c96 = arith.constant 96 : index
    %c0_69 = arith.constant 0 : index
    %326 = vector.load %arg7[%c96, %c0_69] : memref<256x12xf32, #tpu.memory_space<vmem>>, vector<32x12xf32>
    %cst_70 = arith.constant dense<0.000000e+00> : vector<2x12xf32>
    %327 = tpu.matmul %243, %326, %cst_70 {dimension_numbers = #tpu.dot_dimension_numbers<[1], [0], [0], [1], [0, 0, 1, 1], [], []>} : vector<2x32xf32>, vector<32x12xf32>, vector<2x12xf32> -> vector<2x12xf32>
    %328 = arith.addf %325, %327 : vector<2x12xf32>
    %c128 = arith.constant 128 : index
    %c0_71 = arith.constant 0 : index
    %329 = vector.load %arg7[%c128, %c0_71] : memref<256x12xf32, #tpu.memory_space<vmem>>, vector<32x12xf32>
    %cst_72 = arith.constant dense<0.000000e+00> : vector<2x12xf32>
    %330 = tpu.matmul %261, %329, %cst_72 {dimension_numbers = #tpu.dot_dimension_numbers<[1], [0], [0], [1], [0, 0, 1, 1], [], []>} : vector<2x32xf32>, vector<32x12xf32>, vector<2x12xf32> -> vector<2x12xf32>
    %331 = arith.addf %328, %330 : vector<2x12xf32>
    %c160 = arith.constant 160 : index
    %c0_73 = arith.constant 0 : index
    %332 = vector.load %arg7[%c160, %c0_73] : memref<256x12xf32, #tpu.memory_space<vmem>>, vector<32x12xf32>
    %cst_74 = arith.constant dense<0.000000e+00> : vector<2x12xf32>
    %333 = tpu.matmul %279, %332, %cst_74 {dimension_numbers = #tpu.dot_dimension_numbers<[1], [0], [0], [1], [0, 0, 1, 1], [], []>} : vector<2x32xf32>, vector<32x12xf32>, vector<2x12xf32> -> vector<2x12xf32>
    %334 = arith.addf %331, %333 : vector<2x12xf32>
    %c192 = arith.constant 192 : index
    %c0_75 = arith.constant 0 : index
    %335 = vector.load %arg7[%c192, %c0_75] : memref<256x12xf32, #tpu.memory_space<vmem>>, vector<32x12xf32>
    %cst_76 = arith.constant dense<0.000000e+00> : vector<2x12xf32>
    %336 = tpu.matmul %297, %335, %cst_76 {dimension_numbers = #tpu.dot_dimension_numbers<[1], [0], [0], [1], [0, 0, 1, 1], [], []>} : vector<2x32xf32>, vector<32x12xf32>, vector<2x12xf32> -> vector<2x12xf32>
    %337 = arith.addf %334, %336 : vector<2x12xf32>
    %c224 = arith.constant 224 : index
    %c0_77 = arith.constant 0 : index
    %338 = vector.load %arg7[%c224, %c0_77] : memref<256x12xf32, #tpu.memory_space<vmem>>, vector<32x12xf32>
    %cst_78 = arith.constant dense<0.000000e+00> : vector<2x12xf32>
    %339 = tpu.matmul %315, %338, %cst_78 {dimension_numbers = #tpu.dot_dimension_numbers<[1], [0], [0], [1], [0, 0, 1, 1], [], []>} : vector<2x32xf32>, vector<32x12xf32>, vector<2x12xf32> -> vector<2x12xf32>
    %340 = arith.addf %337, %339 : vector<2x12xf32>
    %c0_79 = arith.constant 0 : index
    %c0_80 = arith.constant 0 : index
    %341 = vector.load %arg8[%c0_79, %c0_80] : memref<2x12xf32, #tpu.memory_space<vmem>>, vector<2x12xf32>
    tpu.vector_store %arg8[%c0_79, %c0_80], %340 {strides = array<i32>} : memref<2x12xf32, #tpu.memory_space<vmem>>, vector<2x12xf32>,
    return
  }
}

</mosaic_0001>

<bundles_post_ra>
// kernel: _lambda_.1
= control target key start
LH: loop header
LB: loop body
LE: loop exit
PB: predicated region body
PF: predicated region fallthrough
CT: control target
= control target key end

     0   :  { %13 = vsyncpa [#allocation4], 0  ;;  %s3867_s0 = inlined_call_operand.vmem [shape: f32[16,4], index: 0, kind: input, shape index: {}]   ;;  %s3868_s1 = inlined_call_operand.vmem [shape: f32[4,128], index: 1, kind: input, shape index: {}]   ;;  %s3869_s2 = inlined_call_operand.hbm [shape: f32[32,128], index: 2, kind: input, shape index: {}]   ;;  %s3870_s3 = inlined_call_operand.vmem [shape: f32[1,128], index: 3, kind: input, shape index: {}]   ;;  %s3871_s4 = inlined_call_operand.hbm [shape: f32[32,128], index: 4, kind: input, shape index: {}]   ;;  %s3872_s5 = inlined_call_operand.vmem [shape: f32[32,128], index: 5, kind: input, shape index: {}]   ;;  %s3873_s6 = inlined_call_operand.vmem [shape: f32[1,128], index: 6, kind: input, shape index: {}]   ;;  %s3874_s7 = inlined_call_operand.hbm [shape: f32[256,12], index: 7, kind: input, shape index: {}]   ;;  %s3875_s8 = inlined_call_operand.vmem [shape: f32[2,12], index: 8, kind: output, shape index: {}]  }
   0x1   :  { %14 = vsyncpa [#allocation6], 0  ;;  %s3423_s27 = smov [#allocation5]   ;;  %s3424_s29 = smov [#allocation3]  }
   0x2   :  { %s38_s28 = sshll.u32 %s3423_s27, 4  ;;  %s24_s30 = sshll.u32 %s3424_s29, 4  ;;  %s39_s28 = int_to_ptr.vmem [resolvable:$true] %s38_s28  ;;  %s3478_s30 = int_to_ptr.vmem [resolvable:$true] %s24_s30 }
   0x3   :  { %s3353_s11 = scalar_lea.hbm %s3871_s4, 512 }
   0x4   :  { %p3354_p0 = scmp.ne.s32.totalorder %s3871_s4, %s3353_s11  ;;  %p3357_p1 = scmp.lt.u32.totalorder %s3353_s11, %s3871_s4 }
   0x6   :  { %p3359_p2 = pnand %p3357_p1, %p3354_p0 }
   0x8   :  { %3362 = shalt.err (!%p3359_p2)
}
   0x9   :  { %s3363_s16 = scalar_lea.vmem %s39_s28, 512  ;;  %p3368_p4 = scmp.lt.s32.totalorder %s39_s28, %s39_s28 }
   0xa   :  { %p3364_p3 = scmp.ne.s32.totalorder %s39_s28, %s3363_s16  ;;  %p3369_p5 = scmp.lt.s32.totalorder %s3363_s16, %s3363_s16 }
   0xc   :  { %p3370_p6 = por %p3369_p5, %p3368_p4 }
   0xe   :  { %p3371_p7 = pnand %p3370_p6, %p3364_p3 }
  0x10   :  { %3374 = shalt.err (!%p3371_p7)
}
  0x11   :  { %s3425_s17 = smov 128   ;;  %s3426_s18 = smov 8  }
  0x12   :  { %44 = dma.hbm_to_vmem [thread:$0]  %s3871_s4, 512, %s39_s28, [#allocation6], %s3425_s17, %s3425_s17, %s3426_s18  }
  0x13   :  { %s3375_s23 = scalar_lea.hbm %s3869_s2, 512 }
  0x14   :  { %p3376_p8 = scmp.ne.s32.totalorder %s3869_s2, %s3375_s23  ;;  %p3379_p9 = scmp.lt.u32.totalorder %s3375_s23, %s3869_s2 }
  0x16   :  { %p3381_p10 = pnand %p3379_p9, %p3376_p8 }
  0x18   :  { %3384 = shalt.err (!%p3381_p10)
}
  0x19   :  { %s3385_s29 = scalar_lea.vmem %s3478_s30, 512  ;;  %p3390_p12 = scmp.lt.s32.totalorder %s3478_s30, %s3478_s30 }
  0x1a   :  { %p3386_p11 = scmp.ne.s32.totalorder %s3478_s30, %s3385_s29  ;;  %p3391_p13 = scmp.lt.s32.totalorder %s3385_s29, %s3385_s29 }
  0x1c   :  { %p3392_p0 = por %p3391_p13, %p3390_p12 }
  0x1e   :  { %p3393_p1 = pnand %p3392_p0, %p3386_p11 }
  0x20   :  { %3396 = shalt.err (!%p3393_p1)
}
  0x21   :  { %30 = dma.hbm_to_vmem [thread:$0]  %s3869_s2, 512, %s3478_s30, [#allocation4], %s3425_s17, %s3425_s17, %s3426_s18  }
  0x22   :  { %s3427_s9 = smov [#allocation7]   ;;  %s3397_s13 = scalar_lea.hbm %s3874_s7, 4096 }
  0x23   :  { %s54_s10 = sshll.u32 %s3427_s9, 4  ;;  %p3398_p2 = scmp.ne.s32.totalorder %s3874_s7, %s3397_s13  ;;  %s55_s10 = int_to_ptr.vmem [resolvable:$true] %s54_s10 }
  0x24   :  { %p3401_p3 = scmp.lt.u32.totalorder %s3397_s13, %s3874_s7 }
  0x26   :  { %p3403_p4 = pnand %p3401_p3, %p3398_p2 }
  0x28   :  { %3406 = shalt.err (!%p3403_p4)
}
  0x29   :  { %s3407_s20 = scalar_lea.vmem %s55_s10, 4096  ;;  %p3412_p6 = scmp.lt.s32.totalorder %s55_s10, %s55_s10 }
  0x2a   :  { %p3408_p5 = scmp.ne.s32.totalorder %s55_s10, %s3407_s20  ;;  %p3413_p7 = scmp.lt.s32.totalorder %s3407_s20, %s3407_s20 }
  0x2c   :  { %p3414_p8 = por %p3413_p7, %p3412_p6 }
  0x2e   :  { %p3415_p9 = pnand %p3414_p8, %p3408_p5 }
  0x30   :  { %3418 = shalt.err (!%p3415_p9)
}
  0x31   :  { %60 = dma.hbm_to_vmem [thread:$0]  %s3874_s7, 4096, %s55_s10, [#allocation6], %s3425_s17, %s3425_s17, %s3426_s18  }
  0x32   :  { %3419 = dma.done.wait [#allocation4], 512  }
  0x33   :  { %3420 = vsyncadd [#allocation4], 4294966784 }
  0x34   :  { %3421 = dma.done.wait [#allocation6], 4608  }
  0x35   :  { %3422 = vsyncadd [#allocation6], 4294962688  ;;  %v3428_v0 = vmov 0.0|0.0   ;;  %vm3429_vm0 = vmmov 0   ;;  %v3430_v1 = vmov 0.0   ;;  %vm91_vm1 = vcmask 1043456  }
  0x36   :  { %3091 = vmatprep.subr.bf16.mxu0 %v3428_v0  ;;  %2859 = vmatprep.mubr.msk.f32.mxu0 %vm3429_vm0, %v3430_v1  ;;  %vm84_vm2 = vcmask 31744   ;;  %v70_v2 = vld [vmem:[%s3868_s1] sm:$0xf]  ;;  %v76_v4 = vld [vmem:[%s3867_s0 + $0x8] sm:$0xff]  ;;  %v71_v5 = vld [vmem:[#allocation3] sm:$0xff]  ;;  %s3431_s24 = smov 64  }
  0x37   :  { %v75_v3 = vld [vmem:[%s3867_s0] sm:$0xff]  ;;  %2769 = vmatprep.subr.msk.mxu1 %vm91_vm1, %v70_v2  ;;  %v72_v6 = vld [vmem:[#allocation3 + $0x8] sm:$0xff]  ;;  %v74_v9 = vld [vmem:[#allocation3 + $0x18] sm:$0xff]  ;;  %vm273_vm3 = vcmask 254976   ;;  %vm170_vm4 = vcmask 261120   ;;  %vm382_vm5 = vcmask 257026  }
  0x38   :  { %2771 = vmatprep.mubr.msk.f32.mxu1 %vm84_vm2, %v75_v3  ;;  %v73_v7 = vld [vmem:[#allocation3 + $0x10] sm:$0xff]  ;;  %2770 = vmatpush3.msk.msra.mxu1 %vm91_vm1, %v70_v2  ;;  %v3542_v8 = vpack.c.bf16 %v72_v6, %v71_v5  ;;  %vm606_vm6 = vcmask 261126   ;;  %vm494_vm7 = vcmask 259076   ;;  %vm2587_vm8 = vcmask 91136  }
  0x39   :  { %2772 = vmatmul.mubr.msk.f32.vlgmr.msra.gmra.mrb[0].mxu1 %vm84_vm2, %v76_v4  ;;  %3049 = vmatprep.subr.bf16.mxu1 %v3428_v0  ;;  %v3546_v10 = vpack.c.bf16 %v74_v9, %v73_v7  ;;  %v2595_v11 = vld [vmem:[%s3870_s3] ss:$0 sm:$0xff]  ;;  %s3432_s3 = smov 32  }
  0x3a   :  { %3051 = vmatpush3.bf16.msra.mxu1 %v3542_v8  ;;  %2782 = vmatprep.mubr.msk.f32.mxu1 %vm3429_vm0, %v3430_v1 }
  0x3b   :  { %3052 = vmatprep.subr.bf16.mxu1 %v3428_v0  ;;  %3093 = vmatpush3.bf16.msra.mxu0 %v3542_v8 }
  0x3c   :  { %3094 = vmatprep.subr.bf16.mxu0 %v3428_v0 }
  0x3e   :  { %3054 = vmatpush3.bf16.msra.mxu1 %v3546_v10 }
  0x3f   :  { %3055 = vmatprep.subr.bf16.mxu1 %v3428_v0  ;;  %3096 = vmatpush3.bf16.msra.mxu0 %v3546_v10 }
  0x40   :  { %3105 = vmatprep.subr.bf16.mxu0 %v3428_v0 }
  0x41   :  { %2783 = vmatmul.mubr.f32.vlgmr.msra.gmra.mrb[2].mxu1 %v3430_v1 }
  0x42   :  { %3057 = vmatpush3.bf16.msra.mxu1 %v3542_v8  ;;  %2793 = vmatprep.mubr.msk.f32.mxu1 %vm3429_vm0, %v3430_v1 }
  0x43   :  { %3058 = vmatprep.subr.bf16.mxu1 %v3428_v0 }
  0x46   :  { %3060 = vmatpush3.bf16.msra.mxu1 %v3546_v10 }
  0x47   :  { %3061 = vmatprep.subr.bf16.mxu1 %v3428_v0 }
 0x10c   :  { %v2773_v12 = vpop.f32.mrb[0].mxu1 }
 0x10d   :  { %v3567_v13 = vadd.f32 %v2773_v12, %v2595_v11  ;;  %v161_v14 = vpop.f32.mrb[1].mxu1 }
 0x10e   :  { %v3569_v15 = vadd.f32 %v2595_v11, %v161_v14 }
 0x114   :  { %v240_v16 = vpop.f32.mrb[2].mxu1 }
 0x115   :  { %v244_v17 = vadd.f32 %v240_v16, %v3569_v15  ;;  %v2784_v18 = vpop.f32.mrb[3].mxu1 }
 0x117   :  { %3225 = vtanh.f32 %v244_v17  ;;  %v2599_v20 = vmul.f32 -1.442695, %v244_v17 }
 0x119   :  { %3227 = vpow2.f32 %v2599_v20 }
 0x121   :  { %v3226_v19 = vpop.eup %3225 }
 0x122   :  { %254 = vrot.lane.b32.xlu0 %v3226_v19, %s3431_s24 }
 0x123   :  { %v3228_v21 = vpop.eup %3227 }
 0x124   :  { %v248_v22 = vadd.f32 1.0, %v3228_v21 }
 0x126   :  { %3229 = vrcp.f32 %v248_v22 }
 0x130   :  { %v3230_v23 = vpop.eup %3229 }
 0x131   :  { %v252_v26 = vmul.f32 0.0, %v3230_v23 }
 0x194   :  { %v255_v24 = vpop.permute.xlu0 %254 }
 0x195   :  { %v257_v25 = vmul.f32 %v3230_v23, %v255_v24 }
 0x197   :  { %259 = vrot.lane.b32.xlu0 %v257_v25, %s3432_s3 }
 0x209   :  { %v260_v27 = vpop.permute.xlu0 %259 }
 0x20a   :  { %v262_v28 = vadd.f32 %v260_v27, %v252_v26 }
 0x20c   :  { %3231 = vtanh.f32 %v262_v28  ;;  %v359_v44 = vrot.slane %v262_v28, 6 }
 0x216   :  { %v3232_v29 = vpop.eup %3231 }
 0x217   :  { %265 = vrot.lane.b32.xlu1 %v3232_v29, %s3431_s24 }
 0x289   :  { %v266_v30 = vpop.permute.xlu1 %265 }
 0x28a   :  { %v268_v31 = vmul.f32 %v3230_v23, %v266_v30 }
 0x28c   :  { %270 = vrot.lane.b32.xlu1 %v268_v31, %s3432_s3 }
 0x2fe   :  { %v271_v32 = vpop.permute.xlu1 %270 }
 0x2ff   :  { %274 = vst.msk [vmem:[#allocation2] sm:$0x3] %vm273_vm3, %v271_v32  ;;  %2794 = vmatmul.mubr.msk.f32.vlgmr.msra.gmra.mrb[4].mxu1 %vm170_vm4, %v271_v32 }
 0x300   :  { %3063 = vmatpush3.bf16.msra.mxu1 %v3542_v8  ;;  %2804 = vmatprep.mubr.msk.f32.mxu1 %vm3429_vm0, %v3430_v1 }
 0x301   :  { %3064 = vmatprep.subr.bf16.mxu1 %v3428_v0 }
 0x304   :  { %3066 = vmatpush3.bf16.msra.mxu1 %v3546_v10 }
 0x305   :  { %3067 = vmatprep.subr.bf16.mxu1 %v3428_v0 }
 0x3d2   :  { %v343_v33 = vpop.f32.mrb[4].mxu1 }
 0x3d3   :  { %v348_v34 = vrot.slane %v343_v33, 6  ;;  %v2795_v35 = vpop.f32.mrb[5].mxu1 }
 0x3d5   :  { %v350_v36 = vadd.f32 %v348_v34, %v3569_v15 }
 0x3d7   :  { %3233 = vtanh.f32 %v350_v36  ;;  %v2601_v38 = vmul.f32 -1.442695, %v350_v36 }
 0x3d9   :  { %3235 = vpow2.f32 %v2601_v38 }
 0x3e1   :  { %v3234_v37 = vpop.eup %3233 }
 0x3e2   :  { %363 = vrot.lane.b32.xlu0 %v3234_v37, %s3431_s24 }
 0x3e3   :  { %v3236_v39 = vpop.eup %3235 }
 0x3e4   :  { %v354_v40 = vadd.f32 1.0, %v3236_v39 }
 0x3e6   :  { %3237 = vrcp.f32 %v354_v40 }
 0x3f0   :  { %v3238_v41 = vpop.eup %3237 }
 0x3f1   :  { %v361_v45 = vmul.f32 %v3238_v41, %v359_v44 }
 0x454   :  { %v364_v42 = vpop.permute.xlu0 %363 }
 0x455   :  { %v366_v43 = vmul.f32 %v3238_v41, %v364_v42 }
 0x457   :  { %368 = vrot.lane.b32.xlu1 %v366_v43, %s3432_s3 }
 0x4c9   :  { %v369_v46 = vpop.permute.xlu1 %368 }
 0x4ca   :  { %v371_v47 = vadd.f32 %v369_v46, %v361_v45 }
 0x4cc   :  { %3239 = vtanh.f32 %v371_v47  ;;  %v471_v2 = vrot.slane %v371_v47, 6 }
 0x4d6   :  { %v3240_v48 = vpop.eup %3239 }
 0x4d7   :  { %374 = vrot.lane.b32.xlu0 %v3240_v48, %s3431_s24 }
 0x549   :  { %v375_v49 = vpop.permute.xlu0 %374 }
 0x54a   :  { %v3588_v50 = vmul.f32 %v3238_v41, %v375_v49 }
 0x54c   :  { %v384_v51 = vrot.slane %v3588_v50, 2 }
 0x54e   :  { %385 = vrot.lane.b32.xlu1 %v384_v51, %s3432_s3 }
 0x5c0   :  { %v386_v52 = vpop.permute.xlu1 %385 }
 0x5c1   :  { %2805 = vmatmul.mubr.msk.f32.vlgmr.msra.gmra.mrb[6].mxu1 %vm170_vm4, %v386_v52 }
 0x5c2   :  { %3069 = vmatpush3.bf16.msra.mxu1 %v3542_v8  ;;  %2815 = vmatprep.mubr.msk.f32.mxu1 %vm3429_vm0, %v3430_v1 }
 0x5c3   :  { %3070 = vmatprep.subr.bf16.mxu1 %v3428_v0 }
 0x5c6   :  { %3072 = vmatpush3.bf16.msra.mxu1 %v3546_v10 }
 0x5c7   :  { %3073 = vmatprep.subr.bf16.mxu1 %v3428_v0 }
 0x694   :  { %v455_v53 = vpop.f32.mrb[6].mxu1 }
 0x695   :  { %v460_v54 = vrot.slane %v455_v53, 4  ;;  %v2806_v55 = vpop.f32.mrb[7].mxu1 }
 0x697   :  { %v462_v56 = vadd.f32 %v460_v54, %v3569_v15 }
 0x699   :  { %3241 = vtanh.f32 %v462_v56  ;;  %v2603_v58 = vmul.f32 -1.442695, %v462_v56 }
 0x69b   :  { %3243 = vpow2.f32 %v2603_v58 }
 0x6a3   :  { %v3242_v57 = vpop.eup %3241 }
 0x6a4   :  { %475 = vrot.lane.b32.xlu0 %v3242_v57, %s3431_s24 }
 0x6a5   :  { %v3244_v59 = vpop.eup %3243 }
 0x6a6   :  { %v466_v60 = vadd.f32 1.0, %v3244_v59 }
 0x6a8   :  { %3245 = vrcp.f32 %v466_v60 }
 0x6b2   :  { %v3246_v61 = vpop.eup %3245 }
 0x6b3   :  { %v473_v3 = vmul.f32 %v3246_v61, %v471_v2 }
 0x716   :  { %v476_v62 = vpop.permute.xlu0 %475 }
 0x717   :  { %v478_v63 = vmul.f32 %v3246_v61, %v476_v62 }
 0x719   :  { %480 = vrot.lane.b32.xlu1 %v478_v63, %s3432_s3 }
 0x78b   :  { %v481_v4 = vpop.permute.xlu1 %480 }
 0x78c   :  { %v483_v5 = vadd.f32 %v481_v4, %v473_v3 }
 0x78e   :  { %3247 = vtanh.f32 %v483_v5  ;;  %v583_v26 = vrot.slane %v483_v5, 6 }
 0x798   :  { %v3248_v6 = vpop.eup %3247 }
 0x799   :  { %486 = vrot.lane.b32.xlu0 %v3248_v6, %s3431_s24 }
 0x80b   :  { %v487_v7 = vpop.permute.xlu0 %486 }
 0x80c   :  { %v3603_v9 = vmul.f32 %v3246_v61, %v487_v7 }
 0x80e   :  { %v496_v11 = vrot.slane %v3603_v9, 4 }
 0x810   :  { %497 = vrot.lane.b32.xlu1 %v496_v11, %s3432_s3 }
 0x882   :  { %v498_v12 = vpop.permute.xlu1 %497 }
 0x883   :  { %2816 = vmatmul.mubr.msk.f32.vlgmr.msra.gmra.mrb[8].mxu1 %vm170_vm4, %v498_v12 }
 0x884   :  { %3075 = vmatpush3.bf16.msra.mxu1 %v3542_v8  ;;  %2826 = vmatprep.mubr.msk.f32.mxu1 %vm3429_vm0, %v3430_v1 }
 0x885   :  { %3076 = vmatprep.subr.bf16.mxu1 %v3428_v0 }
 0x888   :  { %3078 = vmatpush3.bf16.msra.mxu1 %v3546_v10 }
 0x889   :  { %3079 = vmatprep.subr.bf16.mxu1 %v3428_v0 }
 0x956   :  { %v567_v14 = vpop.f32.mrb[8].mxu1 }
 0x957   :  { %v572_v16 = vrot.slane %v567_v14, 2  ;;  %v2817_v17 = vpop.f32.mrb[9].mxu1 }
 0x959   :  { %v574_v18 = vadd.f32 %v572_v16, %v3569_v15 }
 0x95b   :  { %3249 = vtanh.f32 %v574_v18  ;;  %v2605_v20 = vmul.f32 -1.442695, %v574_v18 }
 0x95d   :  { %3251 = vpow2.f32 %v2605_v20 }
 0x965   :  { %v3250_v19 = vpop.eup %3249 }
 0x966   :  { %587 = vrot.lane.b32.xlu0 %v3250_v19, %s3431_s24 }
 0x967   :  { %v3252_v21 = vpop.eup %3251 }
 0x968   :  { %v578_v22 = vadd.f32 1.0, %v3252_v21 }
 0x96a   :  { %3253 = vrcp.f32 %v578_v22 }
 0x974   :  { %v3254_v23 = vpop.eup %3253 }
 0x975   :  { %v585_v27 = vmul.f32 %v3254_v23, %v583_v26 }
 0x9d8   :  { %v588_v24 = vpop.permute.xlu0 %587 }
 0x9d9   :  { %v590_v25 = vmul.f32 %v3254_v23, %v588_v24 }
 0x9db   :  { %592 = vrot.lane.b32.xlu1 %v590_v25, %s3432_s3 }
 0xa4d   :  { %v593_v28 = vpop.permute.xlu1 %592 }
 0xa4e   :  { %v595_v29 = vadd.f32 %v593_v28, %v585_v27 }
 0xa50   :  { %3255 = vtanh.f32 %v595_v29  ;;  %v692_v44 = vrot.slane %v595_v29, 6 }
 0xa5a   :  { %v3256_v15 = vpop.eup %3255 }
 0xa5b   :  { %598 = vrot.lane.b32.xlu0 %v3256_v15, %s3431_s24 }
 0xacd   :  { %v599_v30 = vpop.permute.xlu0 %598 }
 0xace   :  { %v3618_v31 = vmul.f32 %v3254_v23, %v599_v30 }
 0xad0   :  { %v608_v32 = vrot.slane %v3618_v31, 6 }
 0xad2   :  { %609 = vrot.lane.b32.xlu1 %v608_v32, %s3432_s3 }
 0xb44   :  { %v610_v33 = vpop.permute.xlu1 %609 }
 0xb45   :  { %2827 = vmatmul.mubr.msk.f32.vlgmr.msra.gmra.mrb[10].mxu1 %vm170_vm4, %v610_v33 }
 0xb46   :  { %3081 = vmatpush3.bf16.msra.mxu1 %v3542_v8  ;;  %2837 = vmatprep.mubr.msk.f32.mxu1 %vm3429_vm0, %v3430_v1 }
 0xb47   :  { %3082 = vmatprep.subr.bf16.mxu1 %v3428_v0 }
 0xb4a   :  { %3084 = vmatpush3.bf16.msra.mxu1 %v3546_v10 }
 0xb4b   :  { %3085 = vmatprep.subr.bf16.mxu1 %v3428_v0 }
 0xc18   :  { %v679_v34 = vpop.f32.mrb[10].mxu1 }
 0xc19   :  { %v683_v35 = vadd.f32 %v679_v34, %v3567_v13  ;;  %v2828_v36 = vpop.f32.mrb[11].mxu1 }
 0xc1b   :  { %3257 = vtanh.f32 %v683_v35  ;;  %v2607_v38 = vmul.f32 -1.442695, %v683_v35 }
 0xc1d   :  { %3259 = vpow2.f32 %v2607_v38 }
 0xc25   :  { %v3258_v37 = vpop.eup %3257 }
 0xc26   :  { %696 = vrot.lane.b32.xlu0 %v3258_v37, %s3431_s24 }
 0xc27   :  { %v3260_v39 = vpop.eup %3259 }
 0xc28   :  { %v687_v40 = vadd.f32 1.0, %v3260_v39 }
 0xc2a   :  { %3261 = vrcp.f32 %v687_v40 }
 0xc34   :  { %v3262_v41 = vpop.eup %3261 }
 0xc35   :  { %v694_v45 = vmul.f32 %v3262_v41, %v692_v44 }
 0xc98   :  { %v697_v42 = vpop.permute.xlu0 %696 }
 0xc99   :  { %v699_v43 = vmul.f32 %v3262_v41, %v697_v42 }
 0xc9b   :  { %701 = vrot.lane.b32.xlu1 %v699_v43, %s3432_s3 }
 0xd0d   :  { %v702_v46 = vpop.permute.xlu1 %701 }
 0xd0e   :  { %v704_v47 = vadd.f32 %v702_v46, %v694_v45 }
 0xd10   :  { %3263 = vtanh.f32 %v704_v47 }
 0xd1a   :  { %v3264_v48 = vpop.eup %3263 }
 0xd1b   :  { %707 = vrot.lane.b32.xlu0 %v3264_v48, %s3431_s24 }
 0xd8d   :  { %v708_v49 = vpop.permute.xlu0 %707 }
 0xd8e   :  { %v710_v51 = vmul.f32 %v3262_v41, %v708_v49 }
 0xd90   :  { %712 = vrot.lane.b32.xlu1 %v710_v51, %s3432_s3 }
 0xe02   :  { %v713_v52 = vpop.permute.xlu1 %712 }
 0xe03   :  { %715 = vst.msk [vmem:[#allocation2 + $0x8] sm:$0x3] %vm273_vm3, %v713_v52  ;;  %2838 = vmatmul.mubr.msk.f32.vlgmr.msra.gmra.mrb[12].mxu1 %vm170_vm4, %v713_v52  ;;  %v1047_v52 = vld [vmem:[#allocation5 + $0x8] sm:$0xff] }
 0xe04   :  { %3087 = vmatpush3.bf16.msra.mxu1 %v3542_v8  ;;  %2848 = vmatprep.mubr.msk.f32.mxu1 %vm3429_vm0, %v3430_v1 }
 0xe05   :  { %3088 = vmatprep.subr.bf16.mxu1 %v3428_v0 }
 0xe08   :  { %3090 = vmatpush3.bf16.msra.mxu1 %v3546_v10  ;;  %v800_v10 = vrot.slane %v704_v47, 6 }
 0xed6   :  { %v784_v53 = vpop.f32.mrb[12].mxu1 }
 0xed7   :  { %v789_v54 = vrot.slane %v784_v53, 6  ;;  %v2839_v55 = vpop.f32.mrb[13].mxu1 }
 0xed8   :  { %v1051_v55 = vld [vmem:[%s3872_s5 + $0x8] sm:$0xff] }
 0xed9   :  { %v791_v56 = vadd.f32 %v789_v54, %v3567_v13  ;;  %v1050_v54 = vld [vmem:[%s3872_s5] sm:$0xff] }
 0xedb   :  { %3265 = vtanh.f32 %v791_v56  ;;  %v2609_v58 = vmul.f32 -1.442695, %v791_v56  ;;  %v1048_v56 = vld [vmem:[#allocation5 + $0x10] sm:$0xff] }
 0xedd   :  { %3267 = vpow2.f32 %v2609_v58  ;;  %v1052_v58 = vld [vmem:[%s3872_s5 + $0x10] sm:$0xff] }
 0xee5   :  { %v3266_v57 = vpop.eup %3265 }
 0xee6   :  { %804 = vrot.lane.b32.xlu0 %v3266_v57, %s3431_s24  ;;  %v3680_v57 = vpack.c.bf16 %v1051_v55, %v1050_v54 }
 0xee7   :  { %v3268_v59 = vpop.eup %3267 }
 0xee8   :  { %v795_v8 = vadd.f32 1.0, %v3268_v59  ;;  %v1053_v59 = vld [vmem:[%s3872_s5 + $0x18] sm:$0xff] }
 0xeea   :  { %3269 = vrcp.f32 %v795_v8 }
 0xef4   :  { %v3270_v60 = vpop.eup %3269 }
 0xef5   :  { %v802_v63 = vmul.f32 %v3270_v60, %v800_v10 }
 0xf58   :  { %v805_v61 = vpop.permute.xlu0 %804 }
 0xf59   :  { %v807_v62 = vmul.f32 %v3270_v60, %v805_v61 }
 0xf5b   :  { %809 = vrot.lane.b32.xlu1 %v807_v62, %s3432_s3 }
 0xfcd   :  { %v810_v2 = vpop.permute.xlu1 %809 }
 0xfce   :  { %v812_v3 = vadd.f32 %v810_v2, %v802_v63 }
 0xfd0   :  { %3271 = vtanh.f32 %v812_v3  ;;  %v911_v25 = vrot.slane %v812_v3, 6 }
 0xfda   :  { %v3272_v4 = vpop.eup %3271 }
 0xfdb   :  { %815 = vrot.lane.b32.xlu0 %v3272_v4, %s3431_s24 }
0x104d   :  { %v816_v5 = vpop.permute.xlu0 %815 }
0x104e   :  { %v3645_v6 = vmul.f32 %v3270_v60, %v816_v5  ;;  %v3689_v60 = vpack.c.bf16 %v1053_v59, %v1052_v58 }
0x1050   :  { %v824_v7 = vrot.slane %v3645_v6, 2 }
0x1052   :  { %825 = vrot.lane.b32.xlu1 %v824_v7, %s3432_s3  ;;  %v2614_v7 = vld [vmem:[%s3873_s6] ss:$0 sm:$0xff] }
0x10c4   :  { %v826_v11 = vpop.permute.xlu1 %825 }
0x10c5   :  { %2849 = vmatmul.mubr.msk.f32.vlgmr.msra.gmra.mrb[14].mxu1 %vm170_vm4, %v826_v11 }
0x1198   :  { %v895_v12 = vpop.f32.mrb[14].mxu1 }
0x1199   :  { %v900_v14 = vrot.slane %v895_v12, 4  ;;  %v2850_v16 = vpop.f32.mrb[15].mxu1 }
0x119b   :  { %v902_v17 = vadd.f32 %v900_v14, %v3567_v13 }
0x119d   :  { %3273 = vtanh.f32 %v902_v17  ;;  %v2611_v19 = vmul.f32 -1.442695, %v902_v17 }
0x119f   :  { %3275 = vpow2.f32 %v2611_v19 }
0x11a7   :  { %v3274_v18 = vpop.eup %3273 }
0x11a8   :  { %915 = vrot.lane.b32.xlu0 %v3274_v18, %s3431_s24 }
0x11a9   :  { %v3276_v20 = vpop.eup %3275 }
0x11aa   :  { %v906_v21 = vadd.f32 1.0, %v3276_v20 }
0x11ac   :  { %3277 = vrcp.f32 %v906_v21 }
0x11b6   :  { %v3278_v22 = vpop.eup %3277 }
0x11b7   :  { %v913_v26 = vmul.f32 %v3278_v22, %v911_v25 }
0x121a   :  { %v916_v23 = vpop.permute.xlu0 %915 }
0x121b   :  { %v918_v24 = vmul.f32 %v3278_v22, %v916_v23 }
0x121d   :  { %920 = vrot.lane.b32.xlu1 %v918_v24, %s3432_s3 }
0x128f   :  { %v921_v27 = vpop.permute.xlu1 %920 }
0x1290   :  { %v923_v28 = vadd.f32 %v921_v27, %v913_v26 }
0x1292   :  { %3279 = vtanh.f32 %v923_v28 }
0x129c   :  { %v3280_v29 = vpop.eup %3279 }
0x129d   :  { %926 = vrot.lane.b32.xlu0 %v3280_v29, %s3431_s24 }
0x130f   :  { %v927_v15 = vpop.permute.xlu0 %926 }
0x1310   :  { %v929_v30 = vmul.f32 %v3278_v22, %v927_v15 }
0x1312   :  { %v935_v32 = vrot.slane %v929_v30, 4 }
0x1314   :  { %936 = vrot.lane.b32.xlu1 %v935_v32, %s3432_s3 }
0x1386   :  { %v937_v33 = vpop.permute.xlu1 %936 }
0x1387   :  { %2860 = vmatmul.mubr.msk.f32.vlgmr.msra.gmra.mrb[0].mxu0 %vm170_vm4, %v937_v33 }
0x1388   :  { %2881 = vmatprep.mubr.msk.f32.mxu0 %vm3429_vm0, %v3430_v1  ;;  %3107 = vmatpush3.bf16.msra.mxu0 %v3680_v57 }
0x1389   :  { %3108 = vmatprep.subr.bf16.mxu0 %v3428_v0 }
0x138c   :  { %3110 = vmatpush3.bf16.msra.mxu0 %v3689_v60 }
0x138d   :  { %3117 = vmatprep.subr.bf16.mxu0 %v3428_v0 }
0x138f   :  { %2882 = vmatmul.mubr.f32.vlgmr.msra.gmra.mrb[2].mxu0 %v3430_v1 }
0x1390   :  { %3119 = vmatpush3.bf16.msra.mxu0 %v3680_v57  ;;  %2903 = vmatprep.mubr.msk.f32.mxu0 %vm3429_vm0, %v3430_v1 }
0x1391   :  { %3120 = vmatprep.subr.bf16.mxu0 %v3428_v0 }
0x1394   :  { %3122 = vmatpush3.bf16.msra.mxu0 %v3689_v60 }
0x1395   :  { %3129 = vmatprep.subr.bf16.mxu0 %v3428_v0 }
0x145a   :  { %v1006_v34 = vpop.f32.mrb[0].mxu0 }
0x145b   :  { %v1011_v35 = vrot.slane %v1006_v34, 2  ;;  %v2861_v36 = vpop.f32.mrb[1].mxu0 }
0x145d   :  { %v1013_v37 = vadd.f32 %v1011_v35, %v3567_v13  ;;  %v1022_v13 = vrot.slane %v923_v28, 6 }
0x145f   :  { %3281 = vtanh.f32 %v1013_v37  ;;  %v2613_v39 = vmul.f32 -1.442695, %v1013_v37 }
0x1461   :  { %3283 = vpow2.f32 %v2613_v39 }
0x1462   :  { %v1210_v5 = vpop.f32.mrb[2].mxu0 }
0x1469   :  { %v3282_v38 = vpop.eup %3281 }
0x146a   :  { %1026 = vrot.lane.b32.xlu0 %v3282_v38, %s3431_s24 }
0x146b   :  { %v3284_v40 = vpop.eup %3283 }
0x146c   :  { %v1017_v41 = vadd.f32 1.0, %v3284_v40 }
0x146e   :  { %3285 = vrcp.f32 %v1017_v41 }
0x1478   :  { %v3286_v42 = vpop.eup %3285 }
0x1479   :  { %v1024_v45 = vmul.f32 %v3286_v42, %v1022_v13 }
0x14dc   :  { %v1027_v43 = vpop.permute.xlu0 %1026 }
0x14dd   :  { %v1029_v44 = vmul.f32 %v3286_v42, %v1027_v43 }
0x14df   :  { %1031 = vrot.lane.b32.xlu1 %v1029_v44, %s3432_s3 }
0x14e3   :  { %379 = vrot.lane.b32.xlu1 %v3588_v50, %s3432_s3 }
0x14e7   :  { %603 = vrot.lane.b32.xlu1 %v3618_v31, %s3432_s3  ;;  %v1046_v31 = vld [vmem:[#allocation5] sm:$0xff] }
0x14e8   :  { %v3097_v53 = vpack.c.bf16 %v1047_v52, %v1046_v31 }
0x14ea   :  { %3098 = vmatprep.subr.bf16.mxu1 %v3097_v53 }
0x14eb   :  { %931 = vrot.lane.b32.xlu1 %v929_v30, %s3432_s3  ;;  %3100 = vmatpush3.bf16.msra.mxu1 %v3097_v53 }
0x1551   :  { %v1032_v46 = vpop.permute.xlu1 %1031 }
0x1552   :  { %v1034_v47 = vadd.f32 %v1032_v46, %v1024_v45 }
0x1554   :  { %3287 = vtanh.f32 %v1034_v47 }
0x1555   :  { %v380_v48 = vpop.permute.xlu1 %379 }
0x1556   :  { %383 = vst.msk [vmem:[#allocation2] sm:$0xc] %vm382_vm5, %v380_v48 }
0x1559   :  { %v604_v49 = vpop.permute.xlu1 %603 }
0x155a   :  { %607 = vst.msk [vmem:[#allocation2] sm:$0xc0] %vm606_vm6, %v604_v49 }
0x155d   :  { %v932_v50 = vpop.permute.xlu1 %931 }
0x155e   :  { %v3288_v51 = vpop.eup %3287  ;;  %934 = vst.msk [vmem:[#allocation2 + $0x8] sm:$0x30] %vm494_vm7, %v932_v50 }
0x155f   :  { %1037 = vrot.lane.b32.xlu0 %v3288_v51, %s3431_s24 }
0x1563   :  { %491 = vrot.lane.b32.xlu0 %v3603_v9, %s3432_s3  ;;  %v1049_v9 = vld [vmem:[#allocation5 + $0x18] sm:$0xff] }
0x1564   :  { %v3101_v8 = vpack.c.bf16 %v1049_v9, %v1048_v56 }
0x1566   :  { %3102 = vmatprep.subr.bf16.mxu1 %v3101_v8 }
0x1567   :  { %820 = vrot.lane.b32.xlu0 %v3645_v6, %s3432_s3  ;;  %3104 = vmatpush3.bf16.msra.mxu1 %v3101_v8  ;;  %v2883_v6 = vpop.f32.mrb[3].mxu0 }
0x1568   :  { %3111 = vmatprep.subr.bf16.mxu1 %v3428_v0 }
0x15d1   :  { %v1038_v61 = vpop.permute.xlu0 %1037 }
0x15d2   :  { %v1040_v62 = vmul.f32 %v3286_v42, %v1038_v61 }
0x15d4   :  { %1042 = vrot.lane.b32.xlu0 %v1040_v62, %s3432_s3 }
0x15d5   :  { %v492_v10 = vpop.permute.xlu0 %491 }
0x15d6   :  { %495 = vst.msk [vmem:[#allocation2] sm:$0x30] %vm494_vm7, %v492_v10 }
0x15d9   :  { %v821_v63 = vpop.permute.xlu0 %820 }
0x15da   :  { %823 = vst.msk [vmem:[#allocation2 + $0x8] sm:$0xc] %vm382_vm5, %v821_v63 }
0x15dd   :  { %v1054_v2 = vld [vmem:[#allocation2] sm:$0xff] }
0x15de   :  { %2870 = vmatprep.mubr.msk.f32.mxu1 %vm170_vm4, %v1054_v2 }
0x1646   :  { %v1043_v3 = vpop.permute.xlu0 %1042 }
0x1647   :  { %1045 = vst.msk [vmem:[#allocation2 + $0x8] sm:$0xc0] %vm606_vm6, %v1043_v3 }
0x164e   :  { %v1055_v4 = vld [vmem:[#allocation2 + $0x8] sm:$0xff] }
0x164f   :  { %2871 = vmatmul.mubr.msk.f32.vlgmr.msra.gmra.mrb[16].mxu1 %vm170_vm4, %v1055_v4 }
0x1650   :  { %3113 = vmatpush3.bf16.msra.mxu1 %v3680_v57  ;;  %2892 = vmatprep.mubr.msk.f32.mxu1 %vm3429_vm0, %v3430_v1 }
0x1651   :  { %3114 = vmatprep.subr.bf16.mxu1 %v3428_v0 }
0x1654   :  { %3116 = vmatpush3.bf16.msra.mxu1 %v3689_v60 }
0x1655   :  { %3123 = vmatprep.subr.bf16.mxu1 %v3428_v0 }
0x1722   :  { %v2872_v11 = vpop.f32.mrb[16].mxu1 }
0x1723   :  { %v3717_v12 = vadd.f32 %v2872_v11, %v2614_v7  ;;  %v1135_v14 = vpop.f32.mrb[17].mxu1 }
0x1724   :  { %v3719_v16 = vadd.f32 %v2614_v7, %v1135_v14 }
0x1726   :  { %v1214_v17 = vadd.f32 %v1210_v5, %v3719_v16 }
0x1728   :  { %3289 = vtanh.f32 %v1214_v17  ;;  %v2617_v19 = vmul.f32 -1.442695, %v1214_v17 }
0x172a   :  { %3291 = vpow2.f32 %v2617_v19 }
0x1732   :  { %v3290_v18 = vpop.eup %3289 }
0x1733   :  { %1224 = vrot.lane.b32.xlu1 %v3290_v18, %s3431_s24 }
0x1734   :  { %v3292_v20 = vpop.eup %3291 }
0x1735   :  { %v1218_v21 = vadd.f32 1.0, %v3292_v20 }
0x1737   :  { %3293 = vrcp.f32 %v1218_v21 }
0x1741   :  { %v3294_v22 = vpop.eup %3293 }
0x1742   :  { %v1222_v25 = vmul.f32 0.0, %v3294_v22 }
0x17a5   :  { %v1225_v23 = vpop.permute.xlu1 %1224 }
0x17a6   :  { %v1227_v24 = vmul.f32 %v3294_v22, %v1225_v23 }
0x17a8   :  { %1229 = vrot.lane.b32.xlu0 %v1227_v24, %s3432_s3 }
0x181a   :  { %v1230_v26 = vpop.permute.xlu0 %1229 }
0x181b   :  { %v1232_v27 = vadd.f32 %v1230_v26, %v1222_v25 }
0x181d   :  { %3295 = vtanh.f32 %v1232_v27  ;;  %v1326_v43 = vrot.slane %v1232_v27, 6 }
0x1827   :  { %v3296_v28 = vpop.eup %3295 }
0x1828   :  { %1235 = vrot.lane.b32.xlu1 %v3296_v28, %s3431_s24 }
0x189a   :  { %v1236_v29 = vpop.permute.xlu1 %1235 }
0x189b   :  { %v1238_v15 = vmul.f32 %v3294_v22, %v1236_v29 }
0x189d   :  { %1240 = vrot.lane.b32.xlu0 %v1238_v15, %s3432_s3 }
0x190f   :  { %v3726_v30 = vpop.permute.xlu0 %1240 }
0x1910   :  { %2893 = vmatmul.mubr.msk.f32.vlgmr.msra.gmra.mrb[18].mxu1 %vm170_vm4, %v3726_v30 }
0x1911   :  { %3125 = vmatpush3.bf16.msra.mxu1 %v3680_v57  ;;  %2914 = vmatprep.mubr.msk.f32.mxu1 %vm3429_vm0, %v3430_v1 }
0x1912   :  { %3126 = vmatprep.subr.bf16.mxu1 %v3428_v0 }
0x1915   :  { %3128 = vmatpush3.bf16.msra.mxu1 %v3689_v60 }
0x1916   :  { %3135 = vmatprep.subr.bf16.mxu1 %v3428_v0 }
0x19e3   :  { %v1310_v32 = vpop.f32.mrb[18].mxu1 }
0x19e4   :  { %v1315_v33 = vrot.slane %v1310_v32, 6  ;;  %v2894_v34 = vpop.f32.mrb[19].mxu1 }
0x19e6   :  { %v1317_v35 = vadd.f32 %v1315_v33, %v3719_v16 }
0x19e8   :  { %3297 = vtanh.f32 %v1317_v35  ;;  %v2619_v37 = vmul.f32 -1.442695, %v1317_v35 }
0x19ea   :  { %3299 = vpow2.f32 %v2619_v37 }
0x19f2   :  { %v3298_v36 = vpop.eup %3297 }
0x19f3   :  { %1330 = vrot.lane.b32.xlu1 %v3298_v36, %s3431_s24 }
0x19f4   :  { %v3300_v38 = vpop.eup %3299 }
0x19f5   :  { %v1321_v39 = vadd.f32 1.0, %v3300_v38 }
0x19f7   :  { %3301 = vrcp.f32 %v1321_v39 }
0x1a01   :  { %v3302_v40 = vpop.eup %3301 }
0x1a02   :  { %v1328_v44 = vmul.f32 %v3302_v40, %v1326_v43 }
0x1a65   :  { %v1331_v41 = vpop.permute.xlu1 %1330 }
0x1a66   :  { %v1333_v42 = vmul.f32 %v3302_v40, %v1331_v41 }
0x1a68   :  { %1335 = vrot.lane.b32.xlu0 %v1333_v42, %s3432_s3 }
0x1ada   :  { %v1336_v13 = vpop.permute.xlu0 %1335 }
0x1adb   :  { %v1338_v45 = vadd.f32 %v1336_v13, %v1328_v44 }
0x1add   :  { %3303 = vtanh.f32 %v1338_v45  ;;  %v1433_v61 = vrot.slane %v1338_v45, 6 }
0x1ae7   :  { %v3304_v46 = vpop.eup %3303 }
0x1ae8   :  { %1341 = vrot.lane.b32.xlu1 %v3304_v46, %s3431_s24 }
0x1b5a   :  { %v1342_v47 = vpop.permute.xlu1 %1341 }
0x1b5b   :  { %v1344_v48 = vmul.f32 %v3302_v40, %v1342_v47 }
0x1b5d   :  { %v1346_v49 = vrot.slane %v1344_v48, 2 }
0x1b5f   :  { %1347 = vrot.lane.b32.xlu0 %v1346_v49, %s3432_s3 }
0x1bd1   :  { %v3741_v50 = vpop.permute.xlu0 %1347 }
0x1bd2   :  { %2904 = vmatmul.mubr.msk.f32.vlgmr.msra.gmra.mrb[4].mxu0 %vm170_vm4, %v3741_v50 }
0x1bd3   :  { %3131 = vmatpush3.bf16.msra.mxu0 %v3680_v57  ;;  %2925 = vmatprep.mubr.msk.f32.mxu0 %vm3429_vm0, %v3430_v1 }
0x1bd4   :  { %3132 = vmatprep.subr.bf16.mxu0 %v3428_v0 }
0x1bd7   :  { %3134 = vmatpush3.bf16.msra.mxu0 %v3689_v60 }
0x1bd8   :  { %3141 = vmatprep.subr.bf16.mxu0 %v3428_v0 }
0x1ca5   :  { %v1417_v51 = vpop.f32.mrb[4].mxu0 }
0x1ca6   :  { %v1422_v31 = vrot.slane %v1417_v51, 4  ;;  %v2905_v52 = vpop.f32.mrb[5].mxu0 }
0x1ca8   :  { %v1424_v53 = vadd.f32 %v1422_v31, %v3719_v16 }
0x1caa   :  { %3305 = vtanh.f32 %v1424_v53  ;;  %v2621_v55 = vmul.f32 -1.442695, %v1424_v53 }
0x1cac   :  { %3307 = vpow2.f32 %v2621_v55 }
0x1cb4   :  { %v3306_v54 = vpop.eup %3305 }
0x1cb5   :  { %1437 = vrot.lane.b32.xlu1 %v3306_v54, %s3431_s24 }
0x1cb6   :  { %v3308_v56 = vpop.eup %3307 }
0x1cb7   :  { %v1428_v9 = vadd.f32 1.0, %v3308_v56 }
0x1cb9   :  { %3309 = vrcp.f32 %v1428_v9 }
0x1cc3   :  { %v3310_v58 = vpop.eup %3309 }
0x1cc4   :  { %v1435_v62 = vmul.f32 %v3310_v58, %v1433_v61 }
0x1d27   :  { %v1438_v59 = vpop.permute.xlu1 %1437 }
0x1d28   :  { %v1440_v8 = vmul.f32 %v3310_v58, %v1438_v59 }
0x1d2a   :  { %1442 = vrot.lane.b32.xlu0 %v1440_v8, %s3432_s3 }
0x1d9c   :  { %v1443_v10 = vpop.permute.xlu0 %1442 }
0x1d9d   :  { %v1445_v63 = vadd.f32 %v1443_v10, %v1435_v62 }
0x1d9f   :  { %3311 = vtanh.f32 %v1445_v63  ;;  %v1540_v25 = vrot.slane %v1445_v63, 6 }
0x1da9   :  { %v3312_v2 = vpop.eup %3311 }
0x1daa   :  { %1448 = vrot.lane.b32.xlu1 %v3312_v2, %s3431_s24 }
0x1e1c   :  { %v1449_v3 = vpop.permute.xlu1 %1448 }
0x1e1d   :  { %v1451_v4 = vmul.f32 %v3310_v58, %v1449_v3 }
0x1e1f   :  { %v1453_v5 = vrot.slane %v1451_v4, 4 }
0x1e21   :  { %1454 = vrot.lane.b32.xlu0 %v1453_v5, %s3432_s3  ;;  %v1987_v5 = vld [vmem:[#allocation7 + $0x20] sm:$0xff] }
0x1e93   :  { %v3756_v6 = vpop.permute.xlu0 %1454 }
0x1e94   :  { %2915 = vmatmul.mubr.msk.f32.vlgmr.msra.gmra.mrb[20].mxu1 %vm170_vm4, %v3756_v6 }
0x1e95   :  { %3137 = vmatpush3.bf16.msra.mxu1 %v3680_v57  ;;  %2936 = vmatprep.mubr.msk.f32.mxu1 %vm3429_vm0, %v3430_v1 }
0x1e96   :  { %3138 = vmatprep.subr.bf16.mxu1 %v3428_v0 }
0x1e99   :  { %3140 = vmatpush3.bf16.msra.mxu1 %v3689_v60 }
0x1e9a   :  { %3147 = vmatprep.subr.bf16.mxu1 %v3428_v0 }
0x1f67   :  { %v1524_v7 = vpop.f32.mrb[20].mxu1 }
0x1f68   :  { %v1529_v11 = vrot.slane %v1524_v7, 2  ;;  %v2916_v14 = vpop.f32.mrb[21].mxu1  ;;  %v1988_v7 = vld [vmem:[#allocation7 + $0x28] sm:$0xff] }
0x1f69   :  { %v1989_v14 = vld [vmem:[#allocation7 + $0x30] sm:$0xff] }
0x1f6a   :  { %v1531_v17 = vadd.f32 %v1529_v11, %v3719_v16  ;;  %v3154_v11 = vpack.c.bf16 %v1988_v7, %v1987_v5 }
0x1f6c   :  { %3313 = vtanh.f32 %v1531_v17  ;;  %v2623_v19 = vmul.f32 -1.442695, %v1531_v17  ;;  %v1990_v17 = vld [vmem:[#allocation7 + $0x38] sm:$0xff] }
0x1f6e   :  { %3315 = vpow2.f32 %v2623_v19  ;;  %v3157_v19 = vpack.c.bf16 %v1990_v17, %v1989_v14 }
0x1f76   :  { %v3314_v18 = vpop.eup %3313 }
0x1f77   :  { %1544 = vrot.lane.b32.xlu1 %v3314_v18, %s3431_s24 }
0x1f78   :  { %v3316_v20 = vpop.eup %3315 }
0x1f79   :  { %v1535_v21 = vadd.f32 1.0, %v3316_v20  ;;  %v1983_v20 = vld [vmem:[#allocation7] sm:$0xff] }
0x1f7b   :  { %3317 = vrcp.f32 %v1535_v21  ;;  %v1984_v21 = vld [vmem:[#allocation7 + $0x8] sm:$0xff] }
0x1f85   :  { %v3318_v22 = vpop.eup %3317 }
0x1f86   :  { %v1542_v26 = vmul.f32 %v3318_v22, %v1540_v25 }
0x1fe9   :  { %v1545_v23 = vpop.permute.xlu1 %1544 }
0x1fea   :  { %v1547_v24 = vmul.f32 %v3318_v22, %v1545_v23  ;;  %v1985_v23 = vld [vmem:[#allocation7 + $0x10] sm:$0xff] }
0x1fec   :  { %1549 = vrot.lane.b32.xlu0 %v1547_v24, %s3432_s3  ;;  %v1986_v24 = vld [vmem:[#allocation7 + $0x18] sm:$0xff] }
0x1fed   :  { %v3163_v25 = vpack.c.bf16 %v1986_v24, %v1985_v23 }
0x205e   :  { %v1550_v27 = vpop.permute.xlu0 %1549 }
0x205f   :  { %v1552_v28 = vadd.f32 %v1550_v27, %v1542_v26  ;;  %v2131_v26 = vld [vmem:[#allocation7 + $0x40] sm:$0xff]  ;;  %v2132_v27 = vld [vmem:[#allocation7 + $0x48] sm:$0xff] }
0x2061   :  { %3319 = vtanh.f32 %v1552_v28  ;;  %v1644_v44 = vrot.slane %v1552_v28, 6  ;;  %v3166_v28 = vpack.c.bf16 %v2132_v27, %v2131_v26 }
0x206b   :  { %v3320_v16 = vpop.eup %3319 }
0x206c   :  { %1555 = vrot.lane.b32.xlu1 %v3320_v16, %s3431_s24  ;;  %v2133_v16 = vld [vmem:[#allocation7 + $0x50] sm:$0xff] }
0x20de   :  { %v1556_v29 = vpop.permute.xlu1 %1555 }
0x20df   :  { %v1558_v15 = vmul.f32 %v3318_v22, %v1556_v29  ;;  %v3160_v22 = vpack.c.bf16 %v1984_v21, %v1983_v20  ;;  %v2134_v29 = vld [vmem:[#allocation7 + $0x58] sm:$0xff] }
0x20e1   :  { %v1560_v32 = vrot.slane %v1558_v15, 6  ;;  %v2206_v15 = vld [vmem:[#allocation7 + $0x60] sm:$0xff] }
0x20e3   :  { %1561 = vrot.lane.b32.xlu0 %v1560_v32, %s3432_s3  ;;  %v2207_v32 = vld [vmem:[#allocation7 + $0x68] sm:$0xff] }
0x2155   :  { %v3771_v33 = vpop.permute.xlu0 %1561 }
0x2156   :  { %2926 = vmatmul.mubr.msk.f32.vlgmr.msra.gmra.mrb[6].mxu0 %vm170_vm4, %v3771_v33 }
0x2157   :  { %3143 = vmatpush3.bf16.msra.mxu0 %v3680_v57  ;;  %2947 = vmatprep.mubr.msk.f32.mxu0 %vm3429_vm0, %v3430_v1 }
0x2158   :  { %3144 = vmatprep.subr.bf16.mxu0 %v3428_v0 }
0x215b   :  { %3146 = vmatpush3.bf16.msra.mxu0 %v3689_v60 }
0x215c   :  { %3153 = vmatprep.subr.bf16.mxu0 %v3428_v0 }
0x2229   :  { %v1631_v34 = vpop.f32.mrb[6].mxu0 }
0x222a   :  { %v1635_v35 = vadd.f32 %v1631_v34, %v3717_v12  ;;  %v2927_v36 = vpop.f32.mrb[7].mxu0  ;;  %v3172_v34 = vpack.c.bf16 %v2207_v32, %v2206_v15  ;;  %v2509_v15 = vld [vmem:[#allocation7 + $0xf8] sm:$0xff] }
0x222b   :  { %v2209_v36 = vld [vmem:[#allocation7 + $0x78] sm:$0xff] }
0x222c   :  { %3321 = vtanh.f32 %v1635_v35  ;;  %v2625_v38 = vmul.f32 -1.442695, %v1635_v35  ;;  %v2208_v35 = vld [vmem:[#allocation7 + $0x70] sm:$0xff] }
0x222e   :  { %3323 = vpow2.f32 %v2625_v38  ;;  %v2282_v38 = vld [vmem:[#allocation7 + $0x88] sm:$0xff] }
0x2236   :  { %v3322_v37 = vpop.eup %3321 }
0x2237   :  { %1648 = vrot.lane.b32.xlu1 %v3322_v37, %s3431_s24  ;;  %v2281_v37 = vld [vmem:[#allocation7 + $0x80] sm:$0xff] }
0x2238   :  { %v3324_v39 = vpop.eup %3323 }
0x2239   :  { %v1639_v40 = vadd.f32 1.0, %v3324_v39  ;;  %v3178_v39 = vpack.c.bf16 %v2282_v38, %v2281_v37 }
0x223b   :  { %3325 = vrcp.f32 %v1639_v40  ;;  %v2283_v40 = vld [vmem:[#allocation7 + $0x90] sm:$0xff] }
0x2245   :  { %v3326_v41 = vpop.eup %3325 }
0x2246   :  { %v1646_v13 = vmul.f32 %v3326_v41, %v1644_v44 }
0x22a9   :  { %v1649_v42 = vpop.permute.xlu1 %1648 }
0x22aa   :  { %v1651_v43 = vmul.f32 %v3326_v41, %v1649_v42  ;;  %v2356_v42 = vld [vmem:[#allocation7 + $0xa0] sm:$0xff] }
0x22ac   :  { %1653 = vrot.lane.b32.xlu0 %v1651_v43, %s3432_s3  ;;  %v2357_v43 = vld [vmem:[#allocation7 + $0xa8] sm:$0xff] }
0x22ad   :  { %v3184_v44 = vpack.c.bf16 %v2357_v43, %v2356_v42 }
0x231e   :  { %v1654_v45 = vpop.permute.xlu0 %1653 }
0x231f   :  { %v1656_v46 = vadd.f32 %v1654_v45, %v1646_v13  ;;  %v2358_v13 = vld [vmem:[#allocation7 + $0xb0] sm:$0xff]  ;;  %v2359_v45 = vld [vmem:[#allocation7 + $0xb8] sm:$0xff] }
0x2321   :  { %3327 = vtanh.f32 %v1656_v46 }
0x232b   :  { %v3328_v47 = vpop.eup %3327 }
0x232c   :  { %1659 = vrot.lane.b32.xlu1 %v3328_v47, %s3431_s24 }
0x239e   :  { %v1660_v48 = vpop.permute.xlu1 %1659 }
0x239f   :  { %v1662_v49 = vmul.f32 %v3326_v41, %v1660_v48  ;;  %v2284_v41 = vld [vmem:[#allocation7 + $0x98] sm:$0xff] }
0x23a1   :  { %1664 = vrot.lane.b32.xlu0 %v1662_v49, %s3432_s3 }
0x2413   :  { %v3786_v51 = vpop.permute.xlu0 %1664 }
0x2414   :  { %2937 = vmatmul.mubr.msk.f32.vlgmr.msra.gmra.mrb[22].mxu1 %vm170_vm4, %v3786_v51 }
0x2415   :  { %3149 = vmatpush3.bf16.msra.mxu1 %v3680_v57  ;;  %2958 = vmatprep.mubr.msk.f32.mxu1 %vm3429_vm0, %v3430_v1 }
0x2416   :  { %3150 = vmatprep.subr.bf16.mxu1 %v3428_v0 }
0x2419   :  { %3152 = vmatpush3.bf16.msra.mxu1 %v3689_v60  ;;  %v1750_v60 = vrot.slane %v1656_v46, 6 }
0x24e7   :  { %v1734_v31 = vpop.f32.mrb[22].mxu1 }
0x24e8   :  { %v1739_v52 = vrot.slane %v1734_v31, 6  ;;  %v2938_v53 = vpop.f32.mrb[23].mxu1 }
0x24ea   :  { %v1741_v54 = vadd.f32 %v1739_v52, %v3717_v12 }
0x24ec   :  { %3329 = vtanh.f32 %v1741_v54  ;;  %v2627_v56 = vmul.f32 -1.442695, %v1741_v54 }
0x24ee   :  { %3331 = vpow2.f32 %v2627_v56 }
0x24f6   :  { %v3330_v55 = vpop.eup %3329 }
0x24f7   :  { %1754 = vrot.lane.b32.xlu1 %v3330_v55, %s3431_s24 }
0x24f8   :  { %v3332_v9 = vpop.eup %3331 }
0x24f9   :  { %v1745_v57 = vadd.f32 1.0, %v3332_v9 }
0x24fb   :  { %3333 = vrcp.f32 %v1745_v57 }
0x2505   :  { %v3334_v58 = vpop.eup %3333 }
0x2506   :  { %v1752_v61 = vmul.f32 %v3334_v58, %v1750_v60  ;;  %v2432_v60 = vld [vmem:[#allocation7 + $0xc8] sm:$0xff] }
0x2569   :  { %v1755_v59 = vpop.permute.xlu1 %1754 }
0x256a   :  { %v1757_v8 = vmul.f32 %v3334_v58, %v1755_v59 }
0x256c   :  { %1759 = vrot.lane.b32.xlu0 %v1757_v8, %s3432_s3  ;;  %v2431_v8 = vld [vmem:[#allocation7 + $0xc0] sm:$0xff] }
0x25de   :  { %v1760_v62 = vpop.permute.xlu0 %1759 }
0x25df   :  { %v3798_v10 = vadd.f32 %v1760_v62, %v1752_v61  ;;  %v2433_v61 = vld [vmem:[#allocation7 + $0xd0] sm:$0xff]  ;;  %v3190_v62 = vpack.c.bf16 %v2432_v60, %v2431_v8 }
0x25e1   :  { %3335 = vtanh.f32 %v3798_v10  ;;  %v1857_v9 = vrot.slane %v3798_v10, 6 }
0x25eb   :  { %v3336_v63 = vpop.eup %3335 }
0x25ec   :  { %1765 = vrot.lane.b32.xlu1 %v3336_v63, %s3431_s24  ;;  %v2434_v63 = vld [vmem:[#allocation7 + $0xd8] sm:$0xff] }
0x265e   :  { %v1766_v2 = vpop.permute.xlu1 %1765 }
0x265f   :  { %v1768_v3 = vmul.f32 %v3334_v58, %v1766_v2  ;;  %v3193_v2 = vpack.c.bf16 %v2434_v63, %v2433_v61 }
0x2661   :  { %v1770_v4 = vrot.slane %v1768_v3, 2 }
0x2663   :  { %1771 = vrot.lane.b32.xlu0 %v1770_v4, %s3432_s3 }
0x26d5   :  { %v3803_v18 = vpop.permute.xlu0 %1771 }
0x26d6   :  { %2948 = vmatmul.mubr.msk.f32.vlgmr.msra.gmra.mrb[8].mxu0 %vm170_vm4, %v3803_v18 }
0x26d7   :  { %3155 = vmatpush3.bf16.msra.mxu0 %v3154_v11  ;;  %2969 = vmatprep.mubr.msk.f32.mxu0 %vm3429_vm0, %v3430_v1 }
0x26d8   :  { %3156 = vmatprep.subr.bf16.mxu0 %v3428_v0 }
0x26db   :  { %3158 = vmatpush3.bf16.msra.mxu0 %v3157_v19 }
0x26dc   :  { %3159 = vmatprep.subr.bf16.mxu0 %v3428_v0 }
0x26de   :  { %2970 = vmatmul.mubr.msk.f32.vlgmr.msra.gmra.mrb[10].mxu0 %vm170_vm4, %v3741_v50  ;;  %v3169_v50 = vpack.c.bf16 %v2134_v29, %v2133_v16  ;;  %v2507_v16 = vld [vmem:[#allocation7 + $0xe8] sm:$0xff]  ;;  %v2508_v29 = vld [vmem:[#allocation7 + $0xf0] sm:$0xff] }
0x26df   :  { %3161 = vmatpush3.bf16.msra.mxu0 %v3160_v22  ;;  %2980 = vmatprep.mubr.msk.f32.mxu0 %vm3429_vm0, %v3430_v1  ;;  %v3199_v32 = vpack.c.bf16 %v2509_v15, %v2508_v29 }
0x26e0   :  { %3162 = vmatprep.subr.bf16.mxu0 %v3428_v0 }
0x26e3   :  { %3164 = vmatpush3.bf16.msra.mxu0 %v3163_v25 }
0x26e4   :  { %3165 = vmatprep.subr.bf16.mxu0 %v3428_v0 }
0x26e6   :  { %2981 = vmatmul.mubr.msk.f32.vlgmr.msra.gmra.mrb[10].mxu0 %vm170_vm4, %v3726_v30  ;;  %v3175_v30 = vpack.c.bf16 %v2209_v36, %v2208_v35 }
0x26e7   :  { %3167 = vmatpush3.bf16.msra.mxu0 %v3166_v28  ;;  %2991 = vmatprep.mubr.msk.f32.mxu0 %vm3429_vm0, %v3430_v1 }
0x26e8   :  { %3168 = vmatprep.subr.bf16.mxu0 %v3428_v0 }
0x26eb   :  { %3170 = vmatpush3.bf16.msra.mxu0 %v3169_v50 }
0x26ec   :  { %3171 = vmatprep.subr.bf16.mxu0 %v3428_v0 }
0x26ee   :  { %2992 = vmatmul.mubr.msk.f32.vlgmr.msra.gmra.mrb[10].mxu0 %vm170_vm4, %v3756_v6  ;;  %v3181_v6 = vpack.c.bf16 %v2284_v41, %v2283_v40 }
0x26ef   :  { %3173 = vmatpush3.bf16.msra.mxu0 %v3172_v34  ;;  %3002 = vmatprep.mubr.msk.f32.mxu0 %vm3429_vm0, %v3430_v1 }
0x26f0   :  { %3174 = vmatprep.subr.bf16.mxu0 %v3428_v0 }
0x26f3   :  { %3176 = vmatpush3.bf16.msra.mxu0 %v3175_v30 }
0x26f4   :  { %3177 = vmatprep.subr.bf16.mxu0 %v3428_v0 }
0x26f6   :  { %3003 = vmatmul.mubr.msk.f32.vlgmr.msra.gmra.mrb[10].mxu0 %vm170_vm4, %v3771_v33  ;;  %v3187_v33 = vpack.c.bf16 %v2359_v45, %v2358_v13 }
0x26f7   :  { %3179 = vmatpush3.bf16.msra.mxu0 %v3178_v39  ;;  %3013 = vmatprep.mubr.msk.f32.mxu0 %vm3429_vm0, %v3430_v1 }
0x26f8   :  { %3180 = vmatprep.subr.bf16.mxu0 %v3428_v0 }
0x26fb   :  { %3182 = vmatpush3.bf16.msra.mxu0 %v3181_v6 }
0x26fc   :  { %3183 = vmatprep.subr.bf16.mxu0 %v3428_v0 }
0x26fe   :  { %3014 = vmatmul.mubr.msk.f32.vlgmr.msra.gmra.mrb[10].mxu0 %vm170_vm4, %v3786_v51 }
0x26ff   :  { %3185 = vmatpush3.bf16.msra.mxu0 %v3184_v44  ;;  %3024 = vmatprep.mubr.msk.f32.mxu0 %vm3429_vm0, %v3430_v1 }
0x2700   :  { %3186 = vmatprep.subr.bf16.mxu0 %v3428_v0 }
0x2703   :  { %3188 = vmatpush3.bf16.msra.mxu0 %v3187_v33 }
0x2704   :  { %3189 = vmatprep.subr.bf16.mxu0 %v3428_v0 }
0x2706   :  { %3025 = vmatmul.mubr.msk.f32.vlgmr.msra.gmra.mrb[10].mxu0 %vm170_vm4, %v3803_v18 }
0x2707   :  { %3035 = vmatprep.mubr.msk.f32.mxu0 %vm3429_vm0, %v3430_v1  ;;  %3191 = vmatpush3.bf16.msra.mxu0 %v3190_v62 }
0x2708   :  { %3192 = vmatprep.subr.bf16.mxu0 %v3428_v0 }
0x270b   :  { %3194 = vmatpush3.bf16.msra.mxu0 %v3193_v2 }
0x270c   :  { %3195 = vmatprep.subr.bf16.mxu0 %v3428_v0 }
0x27a9   :  { %v1841_v46 = vpop.f32.mrb[8].mxu0 }
0x27aa   :  { %v1846_v47 = vrot.slane %v1841_v46, 4  ;;  %v2949_v48 = vpop.f32.mrb[9].mxu0 }
0x27ac   :  { %v1848_v49 = vadd.f32 %v1846_v47, %v3717_v12 }
0x27ae   :  { %3337 = vtanh.f32 %v1848_v49  ;;  %v2629_v31 = vmul.f32 -1.442695, %v1848_v49 }
0x27b0   :  { %3339 = vpow2.f32 %v2629_v31 }
0x27b8   :  { %v3338_v51 = vpop.eup %3337 }
0x27b9   :  { %1861 = vrot.lane.b32.xlu1 %v3338_v51, %s3431_s24 }
0x27ba   :  { %v3340_v52 = vpop.eup %3339 }
0x27bb   :  { %v1852_v53 = vadd.f32 1.0, %v3340_v52 }
0x27bd   :  { %3341 = vrcp.f32 %v1852_v53 }
0x27c7   :  { %v3342_v54 = vpop.eup %3341 }
0x27c8   :  { %v1859_v57 = vmul.f32 %v3342_v54, %v1857_v9 }
0x282b   :  { %v1862_v55 = vpop.permute.xlu1 %1861 }
0x282c   :  { %v1864_v56 = vmul.f32 %v3342_v54, %v1862_v55 }
0x282e   :  { %1866 = vrot.lane.b32.xlu0 %v1864_v56, %s3432_s3 }
0x28a0   :  { %v1867_v58 = vpop.permute.xlu0 %1866 }
0x28a1   :  { %v1869_v59 = vadd.f32 %v1867_v58, %v1859_v57 }
0x28a3   :  { %3343 = vtanh.f32 %v1869_v59 }
0x28ad   :  { %v3344_v3 = vpop.eup %3343 }
0x28ae   :  { %1872 = vrot.lane.b32.xlu1 %v3344_v3, %s3431_s24 }
0x2920   :  { %v1873_v10 = vpop.permute.xlu1 %1872 }
0x2921   :  { %v1875_v4 = vmul.f32 %v3342_v54, %v1873_v10 }
0x2923   :  { %v1877_v5 = vrot.slane %v1875_v4, 4 }
0x2925   :  { %1878 = vrot.lane.b32.xlu0 %v1877_v5, %s3432_s3 }
0x2997   :  { %v1879_v7 = vpop.permute.xlu0 %1878 }
0x2998   :  { %2959 = vmatmul.mubr.msk.f32.vlgmr.msra.gmra.mrb[24].mxu1 %vm170_vm4, %v1879_v7  ;;  %3036 = vmatmul.mubr.msk.f32.vlgmr.msra.gmra.mrb[10].mxu0 %vm170_vm4, %v1879_v7 }
0x2999   :  { %3046 = vmatprep.mubr.msk.f32.mxu0 %vm3429_vm0, %v3430_v1  ;;  %v1964_v1 = vrot.slane %v1869_v59, 6 }
0x2a6b   :  { %v1948_v11 = vpop.f32.mrb[24].mxu1 }
0x2a6c   :  { %v1953_v14 = vrot.slane %v1948_v11, 2  ;;  %v2960_v17 = vpop.f32.mrb[25].mxu1 }
0x2a6e   :  { %v1955_v18 = vadd.f32 %v1953_v14, %v3717_v12  ;;  %v2506_v12 = vld [vmem:[#allocation7 + $0xe0] sm:$0xff] }
0x2a6f   :  { %v3196_v50 = vpack.c.bf16 %v2507_v16, %v2506_v12 }
0x2a70   :  { %3345 = vtanh.f32 %v1955_v18  ;;  %v2631_v20 = vmul.f32 -1.442695, %v1955_v18 }
0x2a71   :  { %3197 = vmatpush3.bf16.msra.mxu0 %v3196_v50 }
0x2a72   :  { %3347 = vpow2.f32 %v2631_v20  ;;  %3198 = vmatprep.subr.bf16.mxu0 %v3428_v0 }
0x2a75   :  { %3200 = vmatpush3.bf16.msra.mxu0 %v3199_v32 }
0x2a7a   :  { %v3346_v19 = vpop.eup %3345 }
0x2a7b   :  { %1968 = vrot.lane.b32.xlu1 %v3346_v19, %s3431_s24 }
0x2a7c   :  { %v3348_v21 = vpop.eup %3347 }
0x2a7d   :  { %v1959_v22 = vadd.f32 1.0, %v3348_v21 }
0x2a7f   :  { %3349 = vrcp.f32 %v1959_v22 }
0x2a89   :  { %v3350_v23 = vpop.eup %3349 }
0x2a8a   :  { %v1966_v26 = vmul.f32 %v3350_v23, %v1964_v1 }
0x2aed   :  { %v1969_v24 = vpop.permute.xlu1 %1968 }
0x2aee   :  { %v1971_v25 = vmul.f32 %v3350_v23, %v1969_v24 }
0x2af0   :  { %1973 = vrot.lane.b32.xlu0 %v1971_v25, %s3432_s3 }
0x2b62   :  { %v1974_v27 = vpop.permute.xlu0 %1973 }
0x2b63   :  { %v1976_v28 = vadd.f32 %v1974_v27, %v1966_v26 }
0x2b65   :  { %3351 = vtanh.f32 %v1976_v28 }
0x2b6f   :  { %v3352_v34 = vpop.eup %3351 }
0x2b70   :  { %1979 = vrot.lane.b32.xlu1 %v3352_v34, %s3431_s24 }
0x2be2   :  { %v1980_v35 = vpop.permute.xlu1 %1979 }
0x2be3   :  { %v1982_v36 = vmul.f32 %v3350_v23, %v1980_v35 }
0x2be5   :  { %v2511_v30 = vrot.slane %v1982_v36, 6 }
0x2be7   :  { %2512 = vrot.lane.b32.xlu0 %v2511_v30, %s3432_s3 }
0x2c59   :  { %v2513_v37 = vpop.permute.xlu0 %2512 }
0x2c5a   :  { %3047 = vmatmul.mubr.msk.f32.vlgmr.msra.gmra.mrb[10].mxu0 %vm170_vm4, %v2513_v37 }
0x2d2d   :  { %v2582_v38 = vpop.f32.mrb[10].mxu0 }
0x2d2e   :  { %2588 = vst.msk [vmem:[%s3875_s8] sm:$0x3] %vm2587_vm8, %v2582_v38  ;;  %v3048_v39 = vpop.f32.mrb[11].mxu0 }
0x2d2f   :  { %2593 = vsyncpa [#allocation4], 1 }
0x2d30   :  { %2594 = vsyncpa [#allocation6], 1 }

</bundles_post_ra>
